<compile_context>
chip_gen: v6e
topology: v6e:2x2x1
jax: 0.10.0
libtpu: 0.0.40
codegen_flags: <defaults>
</compile_context>

<pallas_src>
import math
import jax
import jax.numpy as jnp
from jax.experimental import pallas as pl
from jax.experimental.pallas import tpu as pltpu

# ----------------------------- config ---------------------------------------
HIDDEN = 32            # config.hidden_dim
HEADS = 4              # config.num_heads
HEAD_DIM = HIDDEN // HEADS
FF = HIDDEN * 4        # feed-forward inner dim
LAYERS = 2             # config.num_layers
EPS = 1e-5             # PyTorch LayerNorm default eps


# ----------------------------- shared math -----------------------------------
def _layer_norm(x, gamma, beta):
    mu = jnp.mean(x, axis=-1, keepdims=True)
    var = jnp.mean((x - mu) ** 2, axis=-1, keepdims=True)
    return (x - mu) * jax.lax.rsqrt(var + EPS) * gamma + beta


# ----------------------------- fused per-graph kernel -------------------------
def _make_kernel(num_nodes):
    N = num_nodes

    def kernel(center_ref,                                  # SMEM scalar prefetch: (B,) int32
               x_ref,
               wqkv_ref, bqkv_ref, wo_ref, bo_ref,
               g1_ref, b1_ref, g2_ref, b2_ref,
               wf1_ref, bf1_ref, wf2_ref, bf2_ref,
               fg_ref, fb_ref,
               node_out_ref, center_out_ref):
        b = pl.program_id(0)
        x = x_ref[...]                                      # (N, H) one graph's nodes

        for l in range(LAYERS):                             # static unroll over layers
            # ---- self-attention (pre-LN). Softmax scale pre-folded into Q weights. ----
            xn = _layer_norm(x, g1_ref[l], b1_ref[l])
            qkv = jnp.dot(xn, wqkv_ref[l],
                          preferred_element_type=jnp.float32) + bqkv_ref[l]   # (N, 3H)

            head_outs = []
            for h in range(HEADS):                          # static unroll over heads
                lo = h * HEAD_DIM
                q_h = qkv[:, lo:lo + HEAD_DIM].astype(jnp.bfloat16)
                k_h = qkv[:, HIDDEN + lo:HIDDEN + lo + HEAD_DIM].astype(jnp.bfloat16)
                v_h = qkv[:, 2 * HIDDEN + lo:2 * HIDDEN + lo + HEAD_DIM]

                s = jax.lax.dot_general(q_h, k_h, (((1,), (1,)), ((), ())),
                                        preferred_element_type=jnp.float32)   # (N, N)
                s = s - jnp.max(s, axis=-1, keepdims=True)
                p = jnp.exp(s)
                p = p * pl.reciprocal(jnp.sum(p, axis=-1, keepdims=True), approx=True)
                head_outs.append(
                    jnp.dot(p.astype(jnp.bfloat16), v_h.astype(jnp.bfloat16),
                            preferred_element_type=jnp.float32))              # (N, dh)

            o = jnp.concatenate(head_outs, axis=-1)         # (N, H) lane concat
            attn = jnp.dot(o, wo_ref[l],
                           preferred_element_type=jnp.float32) + bo_ref[l]    # one K=32 matmul
            x = x + attn                                    # residual (dropout = eval no-op)

            # ---- feed-forward (pre-LN) ----
            xn2 = _layer_norm(x, g2_ref[l], b2_ref[l])
            h1 = jnp.dot(xn2, wf1_ref[l], preferred_element_type=jnp.float32) + bf1_ref[l]
            # TODO(synk): PyTorch nn.GELU() defaults to exact-erf GELU; tanh approximation used here.
            h1 = jax.nn.gelu(h1, approximate=True)
            ff = jnp.dot(h1, wf2_ref[l], preferred_element_type=jnp.float32) + bf2_ref[l]
            x = x + ff                                      # residual

        # ---- final LayerNorm ----
        y = _layer_norm(x, fg_ref[...], fb_ref[...])
        node_out_ref[...] = y

        # ---- 'center' pooling: one-hot masked reduce of the in-register value ----
        idx = center_ref[b]                                 # SMEM scalar
        row_ids = jax.lax.broadcasted_iota(jnp.int32, (N, 1), 0)
        center_out_ref[0] = jnp.sum(jnp.where(row_ids == idx, y, 0.0),
                                    axis=0, keepdims=True)  # (1, H)

    return kernel


# ----------------------------- wrapper ----------------------------------------
def rgt_forward(node_features, center_node_idx, params):
    """node_features: (B, N, H) fp32; center_node_idx: (B,) int32."""
    B, N, H = node_features.shape
    assert H == HIDDEN
    assert N % 8 == 0, "per-graph node count must be a multiple of 8 (sublane tiling)"
    x = node_features.reshape(B * N, H).astype(jnp.float32)
    center_node_idx = center_node_idx.astype(jnp.int32)

    # fold the 1/sqrt(head_dim) softmax scale into the Q part of the fused QKV weight+bias
    scale = 1.0 / math.sqrt(HEAD_DIM)
    mult = jnp.concatenate([jnp.full((HIDDEN,), scale, jnp.float32),
                            jnp.ones((2 * HIDDEN,), jnp.float32)])
    weights = [params["wqkv"] * mult, params["bqkv"] * mult,
               params["wo"], params["bo"],
               params["g1"], params["b1"], params["g2"], params["b2"],
               params["wf1"], params["bf1"], params["wf2"], params["bf2"],
               params["final_gamma"], params["final_beta"]]

    def _resident(shape):                       # whole array, same block every step
        nd = len(shape)
        return pl.BlockSpec(shape, lambda b, c, _nd=nd: (0,) * _nd)

    in_specs = [pl.BlockSpec((N, H), lambda b, c: (b, 0))]          # one graph per step
    in_specs += [_resident(w.shape) for w in weights]
    out_specs = (pl.BlockSpec((N, H), lambda b, c: (b, 0)),         # node embeddings
                 pl.BlockSpec((1, 1, H), lambda b, c: (b, 0, 0)))   # center row

    grid_spec = pltpu.PrefetchScalarGridSpec(
        num_scalar_prefetch=1,
        grid=(B,),
        in_specs=in_specs,
        out_specs=out_specs,
    )

    node_emb, center_emb = pl.pallas_call(
        _make_kernel(N),
        grid_spec=grid_spec,
        out_shape=(jax.ShapeDtypeStruct((B * N, H), jnp.float32),
                   jax.ShapeDtypeStruct((B, 1, H), jnp.float32)),
        compiler_params=pltpu.CompilerParams(dimension_semantics=("parallel",)),
    )(center_node_idx, x, *weights)

    center_emb = center_emb.reshape(B, H)
    return {
        "node_embeddings": node_emb,       # (B*N, H), matches torch view(-1, H)
        "graph_embedding": center_emb,     # (B, H)
        "center_embedding": center_emb,    # (B, H)
    }


# ----------------------------- pure-JAX reference ------------------------------
def rgt_reference(node_features, center_node_idx, params):
    B, N, H = node_features.shape
    x = node_features.astype(jnp.float32)                   # (B, N, H), per-graph attention
    for l in range(LAYERS):
        xn = _layer_norm(x, params["g1"][l], params["b1"][l])
        qkv = jnp.einsum('bnd,de->bne', xn, params["wqkv"][l]) + params["bqkv"][l]
        q, k, v = qkv[..., :H], qkv[..., H:2 * H], qkv[..., 2 * H:]
        outs = []
        for h in range(HEADS):
            sl = slice(h * HEAD_DIM, (h + 1) * HEAD_DIM)
            s = jnp.einsum('bqd,bkd->bqk', q[..., sl], k[..., sl]) / math.sqrt(HEAD_DIM)
            p = jax.nn.softmax(s, axis=-1)
            outs.append(jnp.einsum('bqk,bkd->bqd', p, v[..., sl]))
        attn = jnp.concatenate(outs, axis=-1) @ params["wo"][l] + params["bo"][l]
        x = x + attn
        xn2 = _layer_norm(x, params["g2"][l], params["b2"][l])
        hh = jax.nn.gelu(xn2 @ params["wf1"][l] + params["bf1"][l], approximate=True)
        x = x + hh @ params["wf2"][l] + params["bf2"][l]
    x = _layer_norm(x, params["final_gamma"], params["final_beta"])
    node = x.reshape(B * N, H)
    center = x[jnp.arange(B), center_node_idx]
    return node, center


# ----------------------------- param init --------------------------------------
def init_params(key):
    wq, wk, wv, wo, wf1, wf2 = [], [], [], [], [], []
    for _ in range(LAYERS):
        key, *ks = jax.random.split(key, 7)
        wq.append(0.02 * jax.random.normal(ks[0], (HIDDEN, HIDDEN), jnp.float32))
        wk.append(0.02 * jax.random.normal(ks[1], (HIDDEN, HIDDEN), jnp.float32))
        wv.append(0.02 * jax.random.normal(ks[2], (HIDDEN, HIDDEN), jnp.float32))
        wo.append(0.02 * jax.random.normal(ks[3], (HIDDEN, HIDDEN), jnp.float32))
        wf1.append(0.02 * jax.random.normal(ks[4], (HIDDEN, FF), jnp.float32))
        wf2.append(0.02 * jax.random.normal(ks[5], (FF, HIDDEN), jnp.float32))

    params = {
        # fused QKV projection weight/bias, stacked over layers
        "wqkv": jnp.stack([jnp.concatenate([q, k_, v], axis=1)
                           for q, k_, v in zip(wq, wk, wv)]),          # (L, H, 3H)
        "bqkv": jnp.zeros((LAYERS, 1, 3 * HIDDEN), jnp.float32),
        "wo": jnp.stack(wo),                                           # (L, H, H)
        "bo": jnp.zeros((LAYERS, 1, HIDDEN), jnp.float32),
        "g1": jnp.ones((LAYERS, 1, HIDDEN), jnp.float32),
        "b1": jnp.zeros((LAYERS, 1, HIDDEN), jnp.float32),
        "g2": jnp.ones((LAYERS, 1, HIDDEN), jnp.float32),
        "b2": jnp.zeros((LAYERS, 1, HIDDEN), jnp.float32),
        "wf1": jnp.stack(wf1),                                         # (L, H, 4H)
        "bf1": jnp.zeros((LAYERS, 1, FF), jnp.float32),
        "wf2": jnp.stack(wf2),                                         # (L, 4H, H)
        "bf2": jnp.zeros((LAYERS, 1, HIDDEN), jnp.float32),
        "final_gamma": jnp.ones((1, HIDDEN), jnp.float32),
        "final_beta": jnp.zeros((1, HIDDEN), jnp.float32),
    }
    return params


# ----------------------------- main ---------------------------------------------
if __name__ == "__main__":
    key = jax.random.PRNGKey(0)
    kx, kc, kp = jax.random.split(key, 3)

    B, N = 2, 8
    node_features = jax.random.normal(kx, (B, N, HIDDEN), jnp.float32)
    center_node_idx = jax.random.randint(kc, (B,), 0, N, jnp.int32)
    params = init_params(kp)

    outputs = jax.jit(rgt_forward)(node_features, center_node_idx, params)
    jax.block_until_ready(outputs)

    assert outputs["node_embeddings"].shape == (B * N, HIDDEN)
    assert outputs["graph_embedding"].shape == (B, HIDDEN)
    assert outputs["center_embedding"].shape == (B, HIDDEN)

    # correctness check vs. pure-JAX reference (tol covers bf16 MXU inputs + approx recip)
    node_ref, center_ref = rgt_reference(node_features, center_node_idx, params)
    assert bool(jnp.allclose(outputs["node_embeddings"], node_ref, atol=5e-2, rtol=5e-2))
    assert bool(jnp.allclose(outputs["center_embedding"], center_ref, atol=5e-2, rtol=5e-2))

    print("KERNEL_OK")
</pallas_src>

<mosaic_0001>
module attributes {stable_mosaic.version = 11 : i64} {
  func.func @kernel(%arg0: i32, %arg1: memref<2xi32, #tpu.memory_space<smem>>, %arg2: memref<8x32xf32, #tpu.memory_space<vmem>>, %arg3: memref<2x32x96xf32, #tpu.memory_space<vmem>>, %arg4: memref<2x1x96xf32, #tpu.memory_space<vmem>>, %arg5: memref<2x32x32xf32, #tpu.memory_space<vmem>>, %arg6: memref<2x1x32xf32, #tpu.memory_space<vmem>>, %arg7: memref<2x1x32xf32, #tpu.memory_space<vmem>>, %arg8: memref<2x1x32xf32, #tpu.memory_space<vmem>>, %arg9: memref<2x1x32xf32, #tpu.memory_space<vmem>>, %arg10: memref<2x1x32xf32, #tpu.memory_space<vmem>>, %arg11: memref<2x32x128xf32, #tpu.memory_space<vmem>>, %arg12: memref<2x1x128xf32, #tpu.memory_space<vmem>>, %arg13: memref<2x128x32xf32, #tpu.memory_space<vmem>>, %arg14: memref<2x1x32xf32, #tpu.memory_space<vmem>>, %arg15: memref<1x32xf32, #tpu.memory_space<vmem>>, %arg16: memref<1x32xf32, #tpu.memory_space<vmem>>, %arg17: memref<8x32xf32, #tpu.memory_space<vmem>>, %arg18: memref<1x1x32xf32, #tpu.memory_space<vmem>>) attributes {dimension_semantics = [#tpu.dimension_semantics<parallel>], iteration_bounds = array<i64: 2>, scalar_prefetch = 1 : i64, scratch_operands = 0 : i64, tpu.core_type = #tpu.core_type<tc>, window_params = [{transform_indices = @transform_0, window_bounds = array<i64: 8, 32>}, {pipeline_mode = #tpu.pipeline_mode<synchronous>, transform_indices = @transform_1, window_bounds = array<i64: 2, 32, 96>}, {pipeline_mode = #tpu.pipeline_mode<synchronous>, transform_indices = @transform_2, window_bounds = array<i64: 2, 1, 96>}, {pipeline_mode = #tpu.pipeline_mode<synchronous>, transform_indices = @transform_3, window_bounds = array<i64: 2, 32, 32>}, {pipeline_mode = #tpu.pipeline_mode<synchronous>, transform_indices = @transform_4, window_bounds = array<i64: 2, 1, 32>}, {pipeline_mode = #tpu.pipeline_mode<synchronous>, transform_indices = @transform_5, window_bounds = array<i64: 2, 1, 32>}, {pipeline_mode = #tpu.pipeline_mode<synchronous>, transform_indices = @transform_6, window_bounds = array<i64: 2, 1, 32>}, {pipeline_mode = #tpu.pipeline_mode<synchronous>, transform_indices = @transform_7, window_bounds = array<i64: 2, 1, 32>}, {pipeline_mode = #tpu.pipeline_mode<synchronous>, transform_indices = @transform_8, window_bounds = array<i64: 2, 1, 32>}, {pipeline_mode = #tpu.pipeline_mode<synchronous>, transform_indices = @transform_9, window_bounds = array<i64: 2, 32, 128>}, {pipeline_mode = #tpu.pipeline_mode<synchronous>, transform_indices = @transform_10, window_bounds = array<i64: 2, 1, 128>}, {pipeline_mode = #tpu.pipeline_mode<synchronous>, transform_indices = @transform_11, window_bounds = array<i64: 2, 128, 32>}, {pipeline_mode = #tpu.pipeline_mode<synchronous>, transform_indices = @transform_12, window_bounds = array<i64: 2, 1, 32>}, {pipeline_mode = #tpu.pipeline_mode<synchronous>, transform_indices = @transform_13, window_bounds = array<i64: 1, 32>}, {pipeline_mode = #tpu.pipeline_mode<synchronous>, transform_indices = @transform_14, window_bounds = array<i64: 1, 32>}, {transform_indices = @transform_15, window_bounds = array<i64: 8, 32>}, {transform_indices = @transform_16, window_bounds = array<i64: 1, 1, 32>}]} {
    %c0 = arith.constant 0 : index
    %c0_0 = arith.constant 0 : index
    %0 = vector.load %arg2[%c0, %c0_0] : memref<8x32xf32, #tpu.memory_space<vmem>>, vector<8x32xf32>
    %c0_1 = arith.constant 0 : index
    %c0_2 = arith.constant 0 : index
    %c0_3 = arith.constant 0 : index
    %1 = vector.load %arg7[%c0_1, %c0_2, %c0_3] : memref<2x1x32xf32, #tpu.memory_space<vmem>>, vector<1x1x32xf32>
    %2 = vector.shape_cast %1 : vector<1x1x32xf32> to vector<1x32xf32>
    %c0_4 = arith.constant 0 : index
    %c0_5 = arith.constant 0 : index
    %c0_6 = arith.constant 0 : index
    %3 = vector.load %arg8[%c0_4, %c0_5, %c0_6] : memref<2x1x32xf32, #tpu.memory_space<vmem>>, vector<1x1x32xf32>
    %4 = vector.shape_cast %3 : vector<1x1x32xf32> to vector<1x32xf32>
    %cst = arith.constant dense<0.000000e+00> : vector<8xf32>
    %5 = vector.multi_reduction <add>, %0, %cst [1] : vector<8x32xf32> to vector<8xf32>
    %6 = vector.shape_cast %5 : vector<8xf32> to vector<8x1xf32>
    %cst_7 = arith.constant 3.200000e+01 : f32
    %7 = vector.broadcast %cst_7 : f32 to vector<8x1xf32>
    %8 = arith.divf %6, %7 : vector<8x1xf32>
    %9 = vector.broadcast %8 : vector<8x1xf32> to vector<8x32xf32>
    %10 = arith.subf %0, %9 : vector<8x32xf32>
    %11 = arith.mulf %10, %10 : vector<8x32xf32>
    %cst_8 = arith.constant dense<0.000000e+00> : vector<8xf32>
    %12 = vector.multi_reduction <add>, %11, %cst_8 [1] : vector<8x32xf32> to vector<8xf32>
    %13 = vector.shape_cast %12 : vector<8xf32> to vector<8x1xf32>
    %cst_9 = arith.constant 3.200000e+01 : f32
    %14 = vector.broadcast %cst_9 : f32 to vector<8x1xf32>
    %15 = arith.divf %13, %14 : vector<8x1xf32>
    %16 = vector.broadcast %8 : vector<8x1xf32> to vector<8x32xf32>
    %17 = arith.subf %0, %16 : vector<8x32xf32>
    %cst_10 = arith.constant 9.99999974E-6 : f32
    %18 = vector.broadcast %cst_10 : f32 to vector<8x1xf32>
    %19 = arith.addf %15, %18 : vector<8x1xf32>
    %20 = math.rsqrt %19 : vector<8x1xf32>
    %21 = vector.broadcast %20 : vector<8x1xf32> to vector<8x32xf32>
    %22 = arith.mulf %17, %21 : vector<8x32xf32>
    %23 = vector.broadcast %2 : vector<1x32xf32> to vector<8x32xf32>
    %24 = arith.mulf %22, %23 : vector<8x32xf32>
    %25 = vector.broadcast %4 : vector<1x32xf32> to vector<8x32xf32>
    %26 = arith.addf %24, %25 : vector<8x32xf32>
    %c0_11 = arith.constant 0 : index
    %c0_12 = arith.constant 0 : index
    %c0_13 = arith.constant 0 : index
    %27 = vector.load %arg3[%c0_11, %c0_12, %c0_13] : memref<2x32x96xf32, #tpu.memory_space<vmem>>, vector<1x32x96xf32>
    %28 = vector.shape_cast %27 : vector<1x32x96xf32> to vector<32x96xf32>
    %cst_14 = arith.constant dense<0.000000e+00> : vector<8x96xf32>
    %29 = tpu.matmul %26, %28, %cst_14 {dimension_numbers = #tpu.dot_dimension_numbers<[1], [0], [0], [1], [0, 0, 1, 1], [], []>} : vector<8x32xf32>, vector<32x96xf32>, vector<8x96xf32> -> vector<8x96xf32>
    %c0_15 = arith.constant 0 : index
    %c0_16 = arith.constant 0 : index
    %c0_17 = arith.constant 0 : index
    %30 = vector.load %arg4[%c0_15, %c0_16, %c0_17] : memref<2x1x96xf32, #tpu.memory_space<vmem>>, vector<1x1x96xf32>
    %31 = vector.shape_cast %30 : vector<1x1x96xf32> to vector<1x96xf32>
    %32 = vector.broadcast %31 : vector<1x96xf32> to vector<8x96xf32>
    %33 = arith.addf %29, %32 : vector<8x96xf32>
    %34 = vector.extract_strided_slice %33 {offsets = [0, 0], sizes = [8, 8], strides = [1, 1]} : vector<8x96xf32> to vector<8x8xf32>
    %35 = arith.truncf %34 : vector<8x8xf32> to vector<8x8xbf16>
    %36 = vector.extract_strided_slice %33 {offsets = [0, 32], sizes = [8, 8], strides = [1, 1]} : vector<8x96xf32> to vector<8x8xf32>
    %37 = arith.truncf %36 : vector<8x8xf32> to vector<8x8xbf16>
    %38 = vector.extract_strided_slice %33 {offsets = [0, 64], sizes = [8, 8], strides = [1, 1]} : vector<8x96xf32> to vector<8x8xf32>
    %cst_18 = arith.constant dense<0.000000e+00> : vector<8x8xf32>
    %39 = tpu.matmul %35, %37, %cst_18 {dimension_numbers = #tpu.dot_dimension_numbers<[1], [1], [0], [0], [0, 0, 1, 0], [], []>} : vector<8x8xbf16>, vector<8x8xbf16>, vector<8x8xf32> -> vector<8x8xf32>
    %cst_19 = arith.constant dense<0xFF800000> : vector<8xf32>
    %40 = vector.multi_reduction <maximumf>, %39, %cst_19 [1] : vector<8x8xf32> to vector<8xf32>
    %41 = vector.shape_cast %40 : vector<8xf32> to vector<8x1xf32>
    %42 = vector.broadcast %41 : vector<8x1xf32> to vector<8x8xf32>
    %43 = arith.subf %39, %42 : vector<8x8xf32>
    %44 = math.exp %43 : vector<8x8xf32>
    %cst_20 = arith.constant dense<0.000000e+00> : vector<8xf32>
    %45 = vector.multi_reduction <add>, %44, %cst_20 [1] : vector<8x8xf32> to vector<8xf32>
    %46 = vector.shape_cast %45 : vector<8xf32> to vector<8x1xf32>
    %47 = tpu.reciprocal %46 {approx = true} : vector<8x1xf32> -> vector<8x1xf32>
    %48 = vector.broadcast %47 : vector<8x1xf32> to vector<8x8xf32>
    %49 = arith.mulf %44, %48 : vector<8x8xf32>
    %50 = arith.truncf %49 : vector<8x8xf32> to vector<8x8xbf16>
    %51 = arith.truncf %38 : vector<8x8xf32> to vector<8x8xbf16>
    %cst_21 = arith.constant dense<0.000000e+00> : vector<8x8xf32>
    %52 = tpu.matmul %50, %51, %cst_21 {dimension_numbers = #tpu.dot_dimension_numbers<[1], [0], [0], [1], [0, 0, 1, 1], [], []>} : vector<8x8xbf16>, vector<8x8xbf16>, vector<8x8xf32> -> vector<8x8xf32>
    %53 = vector.extract_strided_slice %33 {offsets = [0, 8], sizes = [8, 8], strides = [1, 1]} : vector<8x96xf32> to vector<8x8xf32>
    %54 = arith.truncf %53 : vector<8x8xf32> to vector<8x8xbf16>
    %55 = vector.extract_strided_slice %33 {offsets = [0, 40], sizes = [8, 8], strides = [1, 1]} : vector<8x96xf32> to vector<8x8xf32>
    %56 = arith.truncf %55 : vector<8x8xf32> to vector<8x8xbf16>
    %57 = vector.extract_strided_slice %33 {offsets = [0, 72], sizes = [8, 8], strides = [1, 1]} : vector<8x96xf32> to vector<8x8xf32>
    %cst_22 = arith.constant dense<0.000000e+00> : vector<8x8xf32>
    %58 = tpu.matmul %54, %56, %cst_22 {dimension_numbers = #tpu.dot_dimension_numbers<[1], [1], [0], [0], [0, 0, 1, 0], [], []>} : vector<8x8xbf16>, vector<8x8xbf16>, vector<8x8xf32> -> vector<8x8xf32>
    %cst_23 = arith.constant dense<0xFF800000> : vector<8xf32>
    %59 = vector.multi_reduction <maximumf>, %58, %cst_23 [1] : vector<8x8xf32> to vector<8xf32>
    %60 = vector.shape_cast %59 : vector<8xf32> to vector<8x1xf32>
    %61 = vector.broadcast %60 : vector<8x1xf32> to vector<8x8xf32>
    %62 = arith.subf %58, %61 : vector<8x8xf32>
    %63 = math.exp %62 : vector<8x8xf32>
    %cst_24 = arith.constant dense<0.000000e+00> : vector<8xf32>
    %64 = vector.multi_reduction <add>, %63, %cst_24 [1] : vector<8x8xf32> to vector<8xf32>
    %65 = vector.shape_cast %64 : vector<8xf32> to vector<8x1xf32>
    %66 = tpu.reciprocal %65 {approx = true} : vector<8x1xf32> -> vector<8x1xf32>
    %67 = vector.broadcast %66 : vector<8x1xf32> to vector<8x8xf32>
    %68 = arith.mulf %63, %67 : vector<8x8xf32>
    %69 = arith.truncf %68 : vector<8x8xf32> to vector<8x8xbf16>
    %70 = arith.truncf %57 : vector<8x8xf32> to vector<8x8xbf16>
    %cst_25 = arith.constant dense<0.000000e+00> : vector<8x8xf32>
    %71 = tpu.matmul %69, %70, %cst_25 {dimension_numbers = #tpu.dot_dimension_numbers<[1], [0], [0], [1], [0, 0, 1, 1], [], []>} : vector<8x8xbf16>, vector<8x8xbf16>, vector<8x8xf32> -> vector<8x8xf32>
    %72 = vector.extract_strided_slice %33 {offsets = [0, 16], sizes = [8, 8], strides = [1, 1]} : vector<8x96xf32> to vector<8x8xf32>
    %73 = arith.truncf %72 : vector<8x8xf32> to vector<8x8xbf16>
    %74 = vector.extract_strided_slice %33 {offsets = [0, 48], sizes = [8, 8], strides = [1, 1]} : vector<8x96xf32> to vector<8x8xf32>
    %75 = arith.truncf %74 : vector<8x8xf32> to vector<8x8xbf16>
    %76 = vector.extract_strided_slice %33 {offsets = [0, 80], sizes = [8, 8], strides = [1, 1]} : vector<8x96xf32> to vector<8x8xf32>
    %cst_26 = arith.constant dense<0.000000e+00> : vector<8x8xf32>
    %77 = tpu.matmul %73, %75, %cst_26 {dimension_numbers = #tpu.dot_dimension_numbers<[1], [1], [0], [0], [0, 0, 1, 0], [], []>} : vector<8x8xbf16>, vector<8x8xbf16>, vector<8x8xf32> -> vector<8x8xf32>
    %cst_27 = arith.constant dense<0xFF800000> : vector<8xf32>
    %78 = vector.multi_reduction <maximumf>, %77, %cst_27 [1] : vector<8x8xf32> to vector<8xf32>
    %79 = vector.shape_cast %78 : vector<8xf32> to vector<8x1xf32>
    %80 = vector.broadcast %79 : vector<8x1xf32> to vector<8x8xf32>
    %81 = arith.subf %77, %80 : vector<8x8xf32>
    %82 = math.exp %81 : vector<8x8xf32>
    %cst_28 = arith.constant dense<0.000000e+00> : vector<8xf32>
    %83 = vector.multi_reduction <add>, %82, %cst_28 [1] : vector<8x8xf32> to vector<8xf32>
    %84 = vector.shape_cast %83 : vector<8xf32> to vector<8x1xf32>
    %85 = tpu.reciprocal %84 {approx = true} : vector<8x1xf32> -> vector<8x1xf32>
    %86 = vector.broadcast %85 : vector<8x1xf32> to vector<8x8xf32>
    %87 = arith.mulf %82, %86 : vector<8x8xf32>
    %88 = arith.truncf %87 : vector<8x8xf32> to vector<8x8xbf16>
    %89 = arith.truncf %76 : vector<8x8xf32> to vector<8x8xbf16>
    %cst_29 = arith.constant dense<0.000000e+00> : vector<8x8xf32>
    %90 = tpu.matmul %88, %89, %cst_29 {dimension_numbers = #tpu.dot_dimension_numbers<[1], [0], [0], [1], [0, 0, 1, 1], [], []>} : vector<8x8xbf16>, vector<8x8xbf16>, vector<8x8xf32> -> vector<8x8xf32>
    %91 = vector.extract_strided_slice %33 {offsets = [0, 24], sizes = [8, 8], strides = [1, 1]} : vector<8x96xf32> to vector<8x8xf32>
    %92 = arith.truncf %91 : vector<8x8xf32> to vector<8x8xbf16>
    %93 = vector.extract_strided_slice %33 {offsets = [0, 56], sizes = [8, 8], strides = [1, 1]} : vector<8x96xf32> to vector<8x8xf32>
    %94 = arith.truncf %93 : vector<8x8xf32> to vector<8x8xbf16>
    %95 = vector.extract_strided_slice %33 {offsets = [0, 88], sizes = [8, 8], strides = [1, 1]} : vector<8x96xf32> to vector<8x8xf32>
    %cst_30 = arith.constant dense<0.000000e+00> : vector<8x8xf32>
    %96 = tpu.matmul %92, %94, %cst_30 {dimension_numbers = #tpu.dot_dimension_numbers<[1], [1], [0], [0], [0, 0, 1, 0], [], []>} : vector<8x8xbf16>, vector<8x8xbf16>, vector<8x8xf32> -> vector<8x8xf32>
    %cst_31 = arith.constant dense<0xFF800000> : vector<8xf32>
    %97 = vector.multi_reduction <maximumf>, %96, %cst_31 [1] : vector<8x8xf32> to vector<8xf32>
    %98 = vector.shape_cast %97 : vector<8xf32> to vector<8x1xf32>
    %99 = vector.broadcast %98 : vector<8x1xf32> to vector<8x8xf32>
    %100 = arith.subf %96, %99 : vector<8x8xf32>
    %101 = math.exp %100 : vector<8x8xf32>
    %cst_32 = arith.constant dense<0.000000e+00> : vector<8xf32>
    %102 = vector.multi_reduction <add>, %101, %cst_32 [1] : vector<8x8xf32> to vector<8xf32>
    %103 = vector.shape_cast %102 : vector<8xf32> to vector<8x1xf32>
    %104 = tpu.reciprocal %103 {approx = true} : vector<8x1xf32> -> vector<8x1xf32>
    %105 = vector.broadcast %104 : vector<8x1xf32> to vector<8x8xf32>
    %106 = arith.mulf %101, %105 : vector<8x8xf32>
    %107 = arith.truncf %106 : vector<8x8xf32> to vector<8x8xbf16>
    %108 = arith.truncf %95 : vector<8x8xf32> to vector<8x8xbf16>
    %cst_33 = arith.constant dense<0.000000e+00> : vector<8x8xf32>
    %109 = tpu.matmul %107, %108, %cst_33 {dimension_numbers = #tpu.dot_dimension_numbers<[1], [0], [0], [1], [0, 0, 1, 1], [], []>} : vector<8x8xbf16>, vector<8x8xbf16>, vector<8x8xf32> -> vector<8x8xf32>
    %110 = tpu.concatenate %52, %71, %90, %109 in 1 : vector<8x8xf32>, vector<8x8xf32>, vector<8x8xf32>, vector<8x8xf32> -> vector<8x32xf32>
    %c0_34 = arith.constant 0 : index
    %c0_35 = arith.constant 0 : index
    %c0_36 = arith.constant 0 : index
    %111 = vector.load %arg5[%c0_34, %c0_35, %c0_36] : memref<2x32x32xf32, #tpu.memory_space<vmem>>, vector<1x32x32xf32>
    %112 = vector.shape_cast %111 : vector<1x32x32xf32> to vector<32x32xf32>
    %cst_37 = arith.constant dense<0.000000e+00> : vector<8x32xf32>
    %113 = tpu.matmul %110, %112, %cst_37 {dimension_numbers = #tpu.dot_dimension_numbers<[1], [0], [0], [1], [0, 0, 1, 1], [], []>} : vector<8x32xf32>, vector<32x32xf32>, vector<8x32xf32> -> vector<8x32xf32>
    %c0_38 = arith.constant 0 : index
    %c0_39 = arith.constant 0 : index
    %c0_40 = arith.constant 0 : index
    %114 = vector.load %arg6[%c0_38, %c0_39, %c0_40] : memref<2x1x32xf32, #tpu.memory_space<vmem>>, vector<1x1x32xf32>
    %115 = vector.shape_cast %114 : vector<1x1x32xf32> to vector<1x32xf32>
    %116 = vector.broadcast %115 : vector<1x32xf32> to vector<8x32xf32>
    %117 = arith.addf %113, %116 : vector<8x32xf32>
    %118 = arith.addf %0, %117 : vector<8x32xf32>
    %c0_41 = arith.constant 0 : index
    %c0_42 = arith.constant 0 : index
    %c0_43 = arith.constant 0 : index
    %119 = vector.load %arg9[%c0_41, %c0_42, %c0_43] : memref<2x1x32xf32, #tpu.memory_space<vmem>>, vector<1x1x32xf32>
    %120 = vector.shape_cast %119 : vector<1x1x32xf32> to vector<1x32xf32>
    %c0_44 = arith.constant 0 : index
    %c0_45 = arith.constant 0 : index
    %c0_46 = arith.constant 0 : index
    %121 = vector.load %arg10[%c0_44, %c0_45, %c0_46] : memref<2x1x32xf32, #tpu.memory_space<vmem>>, vector<1x1x32xf32>
    %122 = vector.shape_cast %121 : vector<1x1x32xf32> to vector<1x32xf32>
    %cst_47 = arith.constant dense<0.000000e+00> : vector<8xf32>
    %123 = vector.multi_reduction <add>, %118, %cst_47 [1] : vector<8x32xf32> to vector<8xf32>
    %124 = vector.shape_cast %123 : vector<8xf32> to vector<8x1xf32>
    %cst_48 = arith.constant 3.200000e+01 : f32
    %125 = vector.broadcast %cst_48 : f32 to vector<8x1xf32>
    %126 = arith.divf %124, %125 : vector<8x1xf32>
    %127 = vector.broadcast %126 : vector<8x1xf32> to vector<8x32xf32>
    %128 = arith.subf %118, %127 : vector<8x32xf32>
    %129 = arith.mulf %128, %128 : vector<8x32xf32>
    %cst_49 = arith.constant dense<0.000000e+00> : vector<8xf32>
    %130 = vector.multi_reduction <add>, %129, %cst_49 [1] : vector<8x32xf32> to vector<8xf32>
    %131 = vector.shape_cast %130 : vector<8xf32> to vector<8x1xf32>
    %cst_50 = arith.constant 3.200000e+01 : f32
    %132 = vector.broadcast %cst_50 : f32 to vector<8x1xf32>
    %133 = arith.divf %131, %132 : vector<8x1xf32>
    %134 = vector.broadcast %126 : vector<8x1xf32> to vector<8x32xf32>
    %135 = arith.subf %118, %134 : vector<8x32xf32>
    %cst_51 = arith.constant 9.99999974E-6 : f32
    %136 = vector.broadcast %cst_51 : f32 to vector<8x1xf32>
    %137 = arith.addf %133, %136 : vector<8x1xf32>
    %138 = math.rsqrt %137 : vector<8x1xf32>
    %139 = vector.broadcast %138 : vector<8x1xf32> to vector<8x32xf32>
    %140 = arith.mulf %135, %139 : vector<8x32xf32>
    %141 = vector.broadcast %120 : vector<1x32xf32> to vector<8x32xf32>
    %142 = arith.mulf %140, %141 : vector<8x32xf32>
    %143 = vector.broadcast %122 : vector<1x32xf32> to vector<8x32xf32>
    %144 = arith.addf %142, %143 : vector<8x32xf32>
    %c0_52 = arith.constant 0 : index
    %c0_53 = arith.constant 0 : index
    %c0_54 = arith.constant 0 : index
    %145 = vector.load %arg11[%c0_52, %c0_53, %c0_54] : memref<2x32x128xf32, #tpu.memory_space<vmem>>, vector<1x32x128xf32>
    %146 = vector.shape_cast %145 : vector<1x32x128xf32> to vector<32x128xf32>
    %cst_55 = arith.constant dense<0.000000e+00> : vector<8x128xf32>
    %147 = tpu.matmul %144, %146, %cst_55 {dimension_numbers = #tpu.dot_dimension_numbers<[1], [0], [0], [1], [0, 0, 1, 1], [], []>} : vector<8x32xf32>, vector<32x128xf32>, vector<8x128xf32> -> vector<8x128xf32>
    %c0_56 = arith.constant 0 : index
    %c0_57 = arith.constant 0 : index
    %c0_58 = arith.constant 0 : index
    %148 = vector.load %arg12[%c0_56, %c0_57, %c0_58] : memref<2x1x128xf32, #tpu.memory_space<vmem>>, vector<1x1x128xf32>
    %149 = vector.shape_cast %148 : vector<1x1x128xf32> to vector<1x128xf32>
    %150 = vector.broadcast %149 : vector<1x128xf32> to vector<8x128xf32>
    %151 = arith.addf %147, %150 : vector<8x128xf32>
    %152 = arith.mulf %151, %151 : vector<8x128xf32>
    %153 = arith.mulf %151, %152 : vector<8x128xf32>
    %cst_59 = arith.constant 4.471500e-02 : f32
    %154 = vector.broadcast %cst_59 : f32 to vector<8x128xf32>
    %155 = arith.mulf %154, %153 : vector<8x128xf32>
    %156 = arith.addf %151, %155 : vector<8x128xf32>
    %cst_60 = arith.constant 0.797884583 : f32
    %157 = vector.broadcast %cst_60 : f32 to vector<8x128xf32>
    %158 = arith.mulf %157, %156 : vector<8x128xf32>
    %159 = math.tanh %158 : vector<8x128xf32>
    %cst_61 = arith.constant 1.000000e+00 : f32
    %160 = vector.broadcast %cst_61 : f32 to vector<8x128xf32>
    %161 = arith.addf %160, %159 : vector<8x128xf32>
    %cst_62 = arith.constant 5.000000e-01 : f32
    %162 = vector.broadcast %cst_62 : f32 to vector<8x128xf32>
    %163 = arith.mulf %162, %161 : vector<8x128xf32>
    %164 = arith.mulf %151, %163 : vector<8x128xf32>
    %c0_63 = arith.constant 0 : index
    %c0_64 = arith.constant 0 : index
    %c0_65 = arith.constant 0 : index
    %165 = vector.load %arg13[%c0_63, %c0_64, %c0_65] : memref<2x128x32xf32, #tpu.memory_space<vmem>>, vector<1x128x32xf32>
    %166 = vector.shape_cast %165 : vector<1x128x32xf32> to vector<128x32xf32>
    %cst_66 = arith.constant dense<0.000000e+00> : vector<8x32xf32>
    %167 = tpu.matmul %164, %166, %cst_66 {dimension_numbers = #tpu.dot_dimension_numbers<[1], [0], [0], [1], [0, 0, 1, 1], [], []>} : vector<8x128xf32>, vector<128x32xf32>, vector<8x32xf32> -> vector<8x32xf32>
    %c0_67 = arith.constant 0 : index
    %c0_68 = arith.constant 0 : index
    %c0_69 = arith.constant 0 : index
    %168 = vector.load %arg14[%c0_67, %c0_68, %c0_69] : memref<2x1x32xf32, #tpu.memory_space<vmem>>, vector<1x1x32xf32>
    %169 = vector.shape_cast %168 : vector<1x1x32xf32> to vector<1x32xf32>
    %170 = vector.broadcast %169 : vector<1x32xf32> to vector<8x32xf32>
    %171 = arith.addf %167, %170 : vector<8x32xf32>
    %172 = arith.addf %118, %171 : vector<8x32xf32>
    %c1 = arith.constant 1 : index
    %c0_70 = arith.constant 0 : index
    %c0_71 = arith.constant 0 : index
    %173 = vector.load %arg7[%c1, %c0_70, %c0_71] : memref<2x1x32xf32, #tpu.memory_space<vmem>>, vector<1x1x32xf32>
    %174 = vector.shape_cast %173 : vector<1x1x32xf32> to vector<1x32xf32>
    %c1_72 = arith.constant 1 : index
    %c0_73 = arith.constant 0 : index
    %c0_74 = arith.constant 0 : index
    %175 = vector.load %arg8[%c1_72, %c0_73, %c0_74] : memref<2x1x32xf32, #tpu.memory_space<vmem>>, vector<1x1x32xf32>
    %176 = vector.shape_cast %175 : vector<1x1x32xf32> to vector<1x32xf32>
    %cst_75 = arith.constant dense<0.000000e+00> : vector<8xf32>
    %177 = vector.multi_reduction <add>, %172, %cst_75 [1] : vector<8x32xf32> to vector<8xf32>
    %178 = vector.shape_cast %177 : vector<8xf32> to vector<8x1xf32>
    %cst_76 = arith.constant 3.200000e+01 : f32
    %179 = vector.broadcast %cst_76 : f32 to vector<8x1xf32>
    %180 = arith.divf %178, %179 : vector<8x1xf32>
    %181 = vector.broadcast %180 : vector<8x1xf32> to vector<8x32xf32>
    %182 = arith.subf %172, %181 : vector<8x32xf32>
    %183 = arith.mulf %182, %182 : vector<8x32xf32>
    %cst_77 = arith.constant dense<0.000000e+00> : vector<8xf32>
    %184 = vector.multi_reduction <add>, %183, %cst_77 [1] : vector<8x32xf32> to vector<8xf32>
    %185 = vector.shape_cast %184 : vector<8xf32> to vector<8x1xf32>
    %cst_78 = arith.constant 3.200000e+01 : f32
    %186 = vector.broadcast %cst_78 : f32 to vector<8x1xf32>
    %187 = arith.divf %185, %186 : vector<8x1xf32>
    %188 = vector.broadcast %180 : vector<8x1xf32> to vector<8x32xf32>
    %189 = arith.subf %172, %188 : vector<8x32xf32>
    %cst_79 = arith.constant 9.99999974E-6 : f32
    %190 = vector.broadcast %cst_79 : f32 to vector<8x1xf32>
    %191 = arith.addf %187, %190 : vector<8x1xf32>
    %192 = math.rsqrt %191 : vector<8x1xf32>
    %193 = vector.broadcast %192 : vector<8x1xf32> to vector<8x32xf32>
    %194 = arith.mulf %189, %193 : vector<8x32xf32>
    %195 = vector.broadcast %174 : vector<1x32xf32> to vector<8x32xf32>
    %196 = arith.mulf %194, %195 : vector<8x32xf32>
    %197 = vector.broadcast %176 : vector<1x32xf32> to vector<8x32xf32>
    %198 = arith.addf %196, %197 : vector<8x32xf32>
    %c1_80 = arith.constant 1 : index
    %c0_81 = arith.constant 0 : index
    %c0_82 = arith.constant 0 : index
    %199 = vector.load %arg3[%c1_80, %c0_81, %c0_82] : memref<2x32x96xf32, #tpu.memory_space<vmem>>, vector<1x32x96xf32>
    %200 = vector.shape_cast %199 : vector<1x32x96xf32> to vector<32x96xf32>
    %cst_83 = arith.constant dense<0.000000e+00> : vector<8x96xf32>
    %201 = tpu.matmul %198, %200, %cst_83 {dimension_numbers = #tpu.dot_dimension_numbers<[1], [0], [0], [1], [0, 0, 1, 1], [], []>} : vector<8x32xf32>, vector<32x96xf32>, vector<8x96xf32> -> vector<8x96xf32>
    %c1_84 = arith.constant 1 : index
    %c0_85 = arith.constant 0 : index
    %c0_86 = arith.constant 0 : index
    %202 = vector.load %arg4[%c1_84, %c0_85, %c0_86] : memref<2x1x96xf32, #tpu.memory_space<vmem>>, vector<1x1x96xf32>
    %203 = vector.shape_cast %202 : vector<1x1x96xf32> to vector<1x96xf32>
    %204 = vector.broadcast %203 : vector<1x96xf32> to vector<8x96xf32>
    %205 = arith.addf %201, %204 : vector<8x96xf32>
    %206 = vector.extract_strided_slice %205 {offsets = [0, 0], sizes = [8, 8], strides = [1, 1]} : vector<8x96xf32> to vector<8x8xf32>
    %207 = arith.truncf %206 : vector<8x8xf32> to vector<8x8xbf16>
    %208 = vector.extract_strided_slice %205 {offsets = [0, 32], sizes = [8, 8], strides = [1, 1]} : vector<8x96xf32> to vector<8x8xf32>
    %209 = arith.truncf %208 : vector<8x8xf32> to vector<8x8xbf16>
    %210 = vector.extract_strided_slice %205 {offsets = [0, 64], sizes = [8, 8], strides = [1, 1]} : vector<8x96xf32> to vector<8x8xf32>
    %cst_87 = arith.constant dense<0.000000e+00> : vector<8x8xf32>
    %211 = tpu.matmul %207, %209, %cst_87 {dimension_numbers = #tpu.dot_dimension_numbers<[1], [1], [0], [0], [0, 0, 1, 0], [], []>} : vector<8x8xbf16>, vector<8x8xbf16>, vector<8x8xf32> -> vector<8x8xf32>
    %cst_88 = arith.constant dense<0xFF800000> : vector<8xf32>
    %212 = vector.multi_reduction <maximumf>, %211, %cst_88 [1] : vector<8x8xf32> to vector<8xf32>
    %213 = vector.shape_cast %212 : vector<8xf32> to vector<8x1xf32>
    %214 = vector.broadcast %213 : vector<8x1xf32> to vector<8x8xf32>
    %215 = arith.subf %211, %214 : vector<8x8xf32>
    %216 = math.exp %215 : vector<8x8xf32>
    %cst_89 = arith.constant dense<0.000000e+00> : vector<8xf32>
    %217 = vector.multi_reduction <add>, %216, %cst_89 [1] : vector<8x8xf32> to vector<8xf32>
    %218 = vector.shape_cast %217 : vector<8xf32> to vector<8x1xf32>
    %219 = tpu.reciprocal %218 {approx = true} : vector<8x1xf32> -> vector<8x1xf32>
    %220 = vector.broadcast %219 : vector<8x1xf32> to vector<8x8xf32>
    %221 = arith.mulf %216, %220 : vector<8x8xf32>
    %222 = arith.truncf %221 : vector<8x8xf32> to vector<8x8xbf16>
    %223 = arith.truncf %210 : vector<8x8xf32> to vector<8x8xbf16>
    %cst_90 = arith.constant dense<0.000000e+00> : vector<8x8xf32>
    %224 = tpu.matmul %222, %223, %cst_90 {dimension_numbers = #tpu.dot_dimension_numbers<[1], [0], [0], [1], [0, 0, 1, 1], [], []>} : vector<8x8xbf16>, vector<8x8xbf16>, vector<8x8xf32> -> vector<8x8xf32>
    %225 = vector.extract_strided_slice %205 {offsets = [0, 8], sizes = [8, 8], strides = [1, 1]} : vector<8x96xf32> to vector<8x8xf32>
    %226 = arith.truncf %225 : vector<8x8xf32> to vector<8x8xbf16>
    %227 = vector.extract_strided_slice %205 {offsets = [0, 40], sizes = [8, 8], strides = [1, 1]} : vector<8x96xf32> to vector<8x8xf32>
    %228 = arith.truncf %227 : vector<8x8xf32> to vector<8x8xbf16>
    %229 = vector.extract_strided_slice %205 {offsets = [0, 72], sizes = [8, 8], strides = [1, 1]} : vector<8x96xf32> to vector<8x8xf32>
    %cst_91 = arith.constant dense<0.000000e+00> : vector<8x8xf32>
    %230 = tpu.matmul %226, %228, %cst_91 {dimension_numbers = #tpu.dot_dimension_numbers<[1], [1], [0], [0], [0, 0, 1, 0], [], []>} : vector<8x8xbf16>, vector<8x8xbf16>, vector<8x8xf32> -> vector<8x8xf32>
    %cst_92 = arith.constant dense<0xFF800000> : vector<8xf32>
    %231 = vector.multi_reduction <maximumf>, %230, %cst_92 [1] : vector<8x8xf32> to vector<8xf32>
    %232 = vector.shape_cast %231 : vector<8xf32> to vector<8x1xf32>
    %233 = vector.broadcast %232 : vector<8x1xf32> to vector<8x8xf32>
    %234 = arith.subf %230, %233 : vector<8x8xf32>
    %235 = math.exp %234 : vector<8x8xf32>
    %cst_93 = arith.constant dense<0.000000e+00> : vector<8xf32>
    %236 = vector.multi_reduction <add>, %235, %cst_93 [1] : vector<8x8xf32> to vector<8xf32>
    %237 = vector.shape_cast %236 : vector<8xf32> to vector<8x1xf32>
    %238 = tpu.reciprocal %237 {approx = true} : vector<8x1xf32> -> vector<8x1xf32>
    %239 = vector.broadcast %238 : vector<8x1xf32> to vector<8x8xf32>
    %240 = arith.mulf %235, %239 : vector<8x8xf32>
    %241 = arith.truncf %240 : vector<8x8xf32> to vector<8x8xbf16>
    %242 = arith.truncf %229 : vector<8x8xf32> to vector<8x8xbf16>
    %cst_94 = arith.constant dense<0.000000e+00> : vector<8x8xf32>
    %243 = tpu.matmul %241, %242, %cst_94 {dimension_numbers = #tpu.dot_dimension_numbers<[1], [0], [0], [1], [0, 0, 1, 1], [], []>} : vector<8x8xbf16>, vector<8x8xbf16>, vector<8x8xf32> -> vector<8x8xf32>
    %244 = vector.extract_strided_slice %205 {offsets = [0, 16], sizes = [8, 8], strides = [1, 1]} : vector<8x96xf32> to vector<8x8xf32>
    %245 = arith.truncf %244 : vector<8x8xf32> to vector<8x8xbf16>
    %246 = vector.extract_strided_slice %205 {offsets = [0, 48], sizes = [8, 8], strides = [1, 1]} : vector<8x96xf32> to vector<8x8xf32>
    %247 = arith.truncf %246 : vector<8x8xf32> to vector<8x8xbf16>
    %248 = vector.extract_strided_slice %205 {offsets = [0, 80], sizes = [8, 8], strides = [1, 1]} : vector<8x96xf32> to vector<8x8xf32>
    %cst_95 = arith.constant dense<0.000000e+00> : vector<8x8xf32>
    %249 = tpu.matmul %245, %247, %cst_95 {dimension_numbers = #tpu.dot_dimension_numbers<[1], [1], [0], [0], [0, 0, 1, 0], [], []>} : vector<8x8xbf16>, vector<8x8xbf16>, vector<8x8xf32> -> vector<8x8xf32>
    %cst_96 = arith.constant dense<0xFF800000> : vector<8xf32>
    %250 = vector.multi_reduction <maximumf>, %249, %cst_96 [1] : vector<8x8xf32> to vector<8xf32>
    %251 = vector.shape_cast %250 : vector<8xf32> to vector<8x1xf32>
    %252 = vector.broadcast %251 : vector<8x1xf32> to vector<8x8xf32>
    %253 = arith.subf %249, %252 : vector<8x8xf32>
    %254 = math.exp %253 : vector<8x8xf32>
    %cst_97 = arith.constant dense<0.000000e+00> : vector<8xf32>
    %255 = vector.multi_reduction <add>, %254, %cst_97 [1] : vector<8x8xf32> to vector<8xf32>
    %256 = vector.shape_cast %255 : vector<8xf32> to vector<8x1xf32>
    %257 = tpu.reciprocal %256 {approx = true} : vector<8x1xf32> -> vector<8x1xf32>
    %258 = vector.broadcast %257 : vector<8x1xf32> to vector<8x8xf32>
    %259 = arith.mulf %254, %258 : vector<8x8xf32>
    %260 = arith.truncf %259 : vector<8x8xf32> to vector<8x8xbf16>
    %261 = arith.truncf %248 : vector<8x8xf32> to vector<8x8xbf16>
    %cst_98 = arith.constant dense<0.000000e+00> : vector<8x8xf32>
    %262 = tpu.matmul %260, %261, %cst_98 {dimension_numbers = #tpu.dot_dimension_numbers<[1], [0], [0], [1], [0, 0, 1, 1], [], []>} : vector<8x8xbf16>, vector<8x8xbf16>, vector<8x8xf32> -> vector<8x8xf32>
    %263 = vector.extract_strided_slice %205 {offsets = [0, 24], sizes = [8, 8], strides = [1, 1]} : vector<8x96xf32> to vector<8x8xf32>
    %264 = arith.truncf %263 : vector<8x8xf32> to vector<8x8xbf16>
    %265 = vector.extract_strided_slice %205 {offsets = [0, 56], sizes = [8, 8], strides = [1, 1]} : vector<8x96xf32> to vector<8x8xf32>
    %266 = arith.truncf %265 : vector<8x8xf32> to vector<8x8xbf16>
    %267 = vector.extract_strided_slice %205 {offsets = [0, 88], sizes = [8, 8], strides = [1, 1]} : vector<8x96xf32> to vector<8x8xf32>
    %cst_99 = arith.constant dense<0.000000e+00> : vector<8x8xf32>
    %268 = tpu.matmul %264, %266, %cst_99 {dimension_numbers = #tpu.dot_dimension_numbers<[1], [1], [0], [0], [0, 0, 1, 0], [], []>} : vector<8x8xbf16>, vector<8x8xbf16>, vector<8x8xf32> -> vector<8x8xf32>
    %cst_100 = arith.constant dense<0xFF800000> : vector<8xf32>
    %269 = vector.multi_reduction <maximumf>, %268, %cst_100 [1] : vector<8x8xf32> to vector<8xf32>
    %270 = vector.shape_cast %269 : vector<8xf32> to vector<8x1xf32>
    %271 = vector.broadcast %270 : vector<8x1xf32> to vector<8x8xf32>
    %272 = arith.subf %268, %271 : vector<8x8xf32>
    %273 = math.exp %272 : vector<8x8xf32>
    %cst_101 = arith.constant dense<0.000000e+00> : vector<8xf32>
    %274 = vector.multi_reduction <add>, %273, %cst_101 [1] : vector<8x8xf32> to vector<8xf32>
    %275 = vector.shape_cast %274 : vector<8xf32> to vector<8x1xf32>
    %276 = tpu.reciprocal %275 {approx = true} : vector<8x1xf32> -> vector<8x1xf32>
    %277 = vector.broadcast %276 : vector<8x1xf32> to vector<8x8xf32>
    %278 = arith.mulf %273, %277 : vector<8x8xf32>
    %279 = arith.truncf %278 : vector<8x8xf32> to vector<8x8xbf16>
    %280 = arith.truncf %267 : vector<8x8xf32> to vector<8x8xbf16>
    %cst_102 = arith.constant dense<0.000000e+00> : vector<8x8xf32>
    %281 = tpu.matmul %279, %280, %cst_102 {dimension_numbers = #tpu.dot_dimension_numbers<[1], [0], [0], [1], [0, 0, 1, 1], [], []>} : vector<8x8xbf16>, vector<8x8xbf16>, vector<8x8xf32> -> vector<8x8xf32>
    %282 = tpu.concatenate %224, %243, %262, %281 in 1 : vector<8x8xf32>, vector<8x8xf32>, vector<8x8xf32>, vector<8x8xf32> -> vector<8x32xf32>
    %c1_103 = arith.constant 1 : index
    %c0_104 = arith.constant 0 : index
    %c0_105 = arith.constant 0 : index
    %283 = vector.load %arg5[%c1_103, %c0_104, %c0_105] : memref<2x32x32xf32, #tpu.memory_space<vmem>>, vector<1x32x32xf32>
    %284 = vector.shape_cast %283 : vector<1x32x32xf32> to vector<32x32xf32>
    %cst_106 = arith.constant dense<0.000000e+00> : vector<8x32xf32>
    %285 = tpu.matmul %282, %284, %cst_106 {dimension_numbers = #tpu.dot_dimension_numbers<[1], [0], [0], [1], [0, 0, 1, 1], [], []>} : vector<8x32xf32>, vector<32x32xf32>, vector<8x32xf32> -> vector<8x32xf32>
    %c1_107 = arith.constant 1 : index
    %c0_108 = arith.constant 0 : index
    %c0_109 = arith.constant 0 : index
    %286 = vector.load %arg6[%c1_107, %c0_108, %c0_109] : memref<2x1x32xf32, #tpu.memory_space<vmem>>, vector<1x1x32xf32>
    %287 = vector.shape_cast %286 : vector<1x1x32xf32> to vector<1x32xf32>
    %288 = vector.broadcast %287 : vector<1x32xf32> to vector<8x32xf32>
    %289 = arith.addf %285, %288 : vector<8x32xf32>
    %290 = arith.addf %172, %289 : vector<8x32xf32>
    %c1_110 = arith.constant 1 : index
    %c0_111 = arith.constant 0 : index
    %c0_112 = arith.constant 0 : index
    %291 = vector.load %arg9[%c1_110, %c0_111, %c0_112] : memref<2x1x32xf32, #tpu.memory_space<vmem>>, vector<1x1x32xf32>
    %292 = vector.shape_cast %291 : vector<1x1x32xf32> to vector<1x32xf32>
    %c1_113 = arith.constant 1 : index
    %c0_114 = arith.constant 0 : index
    %c0_115 = arith.constant 0 : index
    %293 = vector.load %arg10[%c1_113, %c0_114, %c0_115] : memref<2x1x32xf32, #tpu.memory_space<vmem>>, vector<1x1x32xf32>
    %294 = vector.shape_cast %293 : vector<1x1x32xf32> to vector<1x32xf32>
    %cst_116 = arith.constant dense<0.000000e+00> : vector<8xf32>
    %295 = vector.multi_reduction <add>, %290, %cst_116 [1] : vector<8x32xf32> to vector<8xf32>
    %296 = vector.shape_cast %295 : vector<8xf32> to vector<8x1xf32>
    %cst_117 = arith.constant 3.200000e+01 : f32
    %297 = vector.broadcast %cst_117 : f32 to vector<8x1xf32>
    %298 = arith.divf %296, %297 : vector<8x1xf32>
    %299 = vector.broadcast %298 : vector<8x1xf32> to vector<8x32xf32>
    %300 = arith.subf %290, %299 : vector<8x32xf32>
    %301 = arith.mulf %300, %300 : vector<8x32xf32>
    %cst_118 = arith.constant dense<0.000000e+00> : vector<8xf32>
    %302 = vector.multi_reduction <add>, %301, %cst_118 [1] : vector<8x32xf32> to vector<8xf32>
    %303 = vector.shape_cast %302 : vector<8xf32> to vector<8x1xf32>
    %cst_119 = arith.constant 3.200000e+01 : f32
    %304 = vector.broadcast %cst_119 : f32 to vector<8x1xf32>
    %305 = arith.divf %303, %304 : vector<8x1xf32>
    %306 = vector.broadcast %298 : vector<8x1xf32> to vector<8x32xf32>
    %307 = arith.subf %290, %306 : vector<8x32xf32>
    %cst_120 = arith.constant 9.99999974E-6 : f32
    %308 = vector.broadcast %cst_120 : f32 to vector<8x1xf32>
    %309 = arith.addf %305, %308 : vector<8x1xf32>
    %310 = math.rsqrt %309 : vector<8x1xf32>
    %311 = vector.broadcast %310 : vector<8x1xf32> to vector<8x32xf32>
    %312 = arith.mulf %307, %311 : vector<8x32xf32>
    %313 = vector.broadcast %292 : vector<1x32xf32> to vector<8x32xf32>
    %314 = arith.mulf %312, %313 : vector<8x32xf32>
    %315 = vector.broadcast %294 : vector<1x32xf32> to vector<8x32xf32>
    %316 = arith.addf %314, %315 : vector<8x32xf32>
    %c1_121 = arith.constant 1 : index
    %c0_122 = arith.constant 0 : index
    %c0_123 = arith.constant 0 : index
    %317 = vector.load %arg11[%c1_121, %c0_122, %c0_123] : memref<2x32x128xf32, #tpu.memory_space<vmem>>, vector<1x32x128xf32>
    %318 = vector.shape_cast %317 : vector<1x32x128xf32> to vector<32x128xf32>
    %cst_124 = arith.constant dense<0.000000e+00> : vector<8x128xf32>
    %319 = tpu.matmul %316, %318, %cst_124 {dimension_numbers = #tpu.dot_dimension_numbers<[1], [0], [0], [1], [0, 0, 1, 1], [], []>} : vector<8x32xf32>, vector<32x128xf32>, vector<8x128xf32> -> vector<8x128xf32>
    %c1_125 = arith.constant 1 : index
    %c0_126 = arith.constant 0 : index
    %c0_127 = arith.constant 0 : index
    %320 = vector.load %arg12[%c1_125, %c0_126, %c0_127] : memref<2x1x128xf32, #tpu.memory_space<vmem>>, vector<1x1x128xf32>
    %321 = vector.shape_cast %320 : vector<1x1x128xf32> to vector<1x128xf32>
    %322 = vector.broadcast %321 : vector<1x128xf32> to vector<8x128xf32>
    %323 = arith.addf %319, %322 : vector<8x128xf32>
    %324 = arith.mulf %323, %323 : vector<8x128xf32>
    %325 = arith.mulf %323, %324 : vector<8x128xf32>
    %cst_128 = arith.constant 4.471500e-02 : f32
    %326 = vector.broadcast %cst_128 : f32 to vector<8x128xf32>
    %327 = arith.mulf %326, %325 : vector<8x128xf32>
    %328 = arith.addf %323, %327 : vector<8x128xf32>
    %cst_129 = arith.constant 0.797884583 : f32
    %329 = vector.broadcast %cst_129 : f32 to vector<8x128xf32>
    %330 = arith.mulf %329, %328 : vector<8x128xf32>
    %331 = math.tanh %330 : vector<8x128xf32>
    %cst_130 = arith.constant 1.000000e+00 : f32
    %332 = vector.broadcast %cst_130 : f32 to vector<8x128xf32>
    %333 = arith.addf %332, %331 : vector<8x128xf32>
    %cst_131 = arith.constant 5.000000e-01 : f32
    %334 = vector.broadcast %cst_131 : f32 to vector<8x128xf32>
    %335 = arith.mulf %334, %333 : vector<8x128xf32>
    %336 = arith.mulf %323, %335 : vector<8x128xf32>
    %c1_132 = arith.constant 1 : index
    %c0_133 = arith.constant 0 : index
    %c0_134 = arith.constant 0 : index
    %337 = vector.load %arg13[%c1_132, %c0_133, %c0_134] : memref<2x128x32xf32, #tpu.memory_space<vmem>>, vector<1x128x32xf32>
    %338 = vector.shape_cast %337 : vector<1x128x32xf32> to vector<128x32xf32>
    %cst_135 = arith.constant dense<0.000000e+00> : vector<8x32xf32>
    %339 = tpu.matmul %336, %338, %cst_135 {dimension_numbers = #tpu.dot_dimension_numbers<[1], [0], [0], [1], [0, 0, 1, 1], [], []>} : vector<8x128xf32>, vector<128x32xf32>, vector<8x32xf32> -> vector<8x32xf32>
    %c1_136 = arith.constant 1 : index
    %c0_137 = arith.constant 0 : index
    %c0_138 = arith.constant 0 : index
    %340 = vector.load %arg14[%c1_136, %c0_137, %c0_138] : memref<2x1x32xf32, #tpu.memory_space<vmem>>, vector<1x1x32xf32>
    %341 = vector.shape_cast %340 : vector<1x1x32xf32> to vector<1x32xf32>
    %342 = vector.broadcast %341 : vector<1x32xf32> to vector<8x32xf32>
    %343 = arith.addf %339, %342 : vector<8x32xf32>
    %344 = arith.addf %290, %343 : vector<8x32xf32>
    %c0_139 = arith.constant 0 : index
    %c0_140 = arith.constant 0 : index
    %345 = vector.load %arg15[%c0_139, %c0_140] : memref<1x32xf32, #tpu.memory_space<vmem>>, vector<1x32xf32>
    %c0_141 = arith.constant 0 : index
    %c0_142 = arith.constant 0 : index
    %346 = vector.load %arg16[%c0_141, %c0_142] : memref<1x32xf32, #tpu.memory_space<vmem>>, vector<1x32xf32>
    %cst_143 = arith.constant dense<0.000000e+00> : vector<8xf32>
    %347 = vector.multi_reduction <add>, %344, %cst_143 [1] : vector<8x32xf32> to vector<8xf32>
    %348 = vector.shape_cast %347 : vector<8xf32> to vector<8x1xf32>
    %cst_144 = arith.constant 3.200000e+01 : f32
    %349 = vector.broadcast %cst_144 : f32 to vector<8x1xf32>
    %350 = arith.divf %348, %349 : vector<8x1xf32>
    %351 = vector.broadcast %350 : vector<8x1xf32> to vector<8x32xf32>
    %352 = arith.subf %344, %351 : vector<8x32xf32>
    %353 = arith.mulf %352, %352 : vector<8x32xf32>
    %cst_145 = arith.constant dense<0.000000e+00> : vector<8xf32>
    %354 = vector.multi_reduction <add>, %353, %cst_145 [1] : vector<8x32xf32> to vector<8xf32>
    %355 = vector.shape_cast %354 : vector<8xf32> to vector<8x1xf32>
    %cst_146 = arith.constant 3.200000e+01 : f32
    %356 = vector.broadcast %cst_146 : f32 to vector<8x1xf32>
    %357 = arith.divf %355, %356 : vector<8x1xf32>
    %358 = vector.broadcast %350 : vector<8x1xf32> to vector<8x32xf32>
    %359 = arith.subf %344, %358 : vector<8x32xf32>
    %cst_147 = arith.constant 9.99999974E-6 : f32
    %360 = vector.broadcast %cst_147 : f32 to vector<8x1xf32>
    %361 = arith.addf %357, %360 : vector<8x1xf32>
    %362 = math.rsqrt %361 : vector<8x1xf32>
    %363 = vector.broadcast %362 : vector<8x1xf32> to vector<8x32xf32>
    %364 = arith.mulf %359, %363 : vector<8x32xf32>
    %365 = vector.broadcast %345 : vector<1x32xf32> to vector<8x32xf32>
    %366 = arith.mulf %364, %365 : vector<8x32xf32>
    %367 = vector.broadcast %346 : vector<1x32xf32> to vector<8x32xf32>
    %368 = arith.addf %366, %367 : vector<8x32xf32>
    %c0_148 = arith.constant 0 : index
    %c0_149 = arith.constant 0 : index
    %369 = vector.load %arg17[%c0_148, %c0_149] : memref<8x32xf32, #tpu.memory_space<vmem>>, vector<8x32xf32>
    tpu.vector_store %arg17[%c0_148, %c0_149], %368 {strides = array<i32>} : memref<8x32xf32, #tpu.memory_space<vmem>>, vector<8x32xf32>,
    %370 = arith.index_cast %arg0 : i32 to index
    %371 = memref.load %arg1[%370] : memref<2xi32, #tpu.memory_space<smem>>
    %372 = tpu.iota {dimensions = array<i32: 0>} : vector<8x1xi32>
    %373 = vector.broadcast %371 : i32 to vector<8x1xi32>
    %374 = arith.cmpi eq, %372, %373 : vector<8x1xi32>
    %cst_150 = arith.constant 0.000000e+00 : f32
    %375 = vector.shape_cast %374 : vector<8x1xi1> to vector<8x1xi1>
    %376 = vector.broadcast %375 : vector<8x1xi1> to vector<8x32xi1>
    %377 = vector.broadcast %cst_150 : f32 to vector<8x32xf32>
    %378 = arith.select %376, %368, %377 : vector<8x32xi1>, vector<8x32xf32>
    %cst_151 = arith.constant dense<0.000000e+00> : vector<32xf32>
    %379 = vector.multi_reduction <add>, %378, %cst_151 [0] : vector<8x32xf32> to vector<32xf32>
    %380 = vector.shape_cast %379 : vector<32xf32> to vector<1x32xf32>
    %c0_152 = arith.constant 0 : index
    %c0_153 = arith.constant 0 : index
    %c0_154 = arith.constant 0 : index
    %381 = vector.load %arg18[%c0_152, %c0_153, %c0_154] : memref<1x1x32xf32, #tpu.memory_space<vmem>>, vector<1x1x32xf32>
    %382 = vector.shape_cast %381 : vector<1x1x32xf32> to vector<1x32xf32>
    %383 = vector.shape_cast %380 : vector<1x32xf32> to vector<1x1x32xf32>
    tpu.vector_store %arg18[%c0_152, %c0_153, %c0_154], %383 {strides = array<i32>} : memref<1x1x32xf32, #tpu.memory_space<vmem>>, vector<1x1x32xf32>,
    return
  }
  func.func @transform_0(%arg0: i32, %arg1: memref<2xi32, #tpu.memory_space<smem>>) -> (i32, i32) {
    %c0_i32 = arith.constant 0 : i32
    %c0_i32_0 = arith.constant 0 : i32
    return %arg0, %c0_i32 : i32, i32
  }
  func.func @transform_1(%arg0: i32, %arg1: memref<2xi32, #tpu.memory_space<smem>>) -> (i32, i32, i32) {
    %c0_i32 = arith.constant 0 : i32
    %c0_i32_0 = arith.constant 0 : i32
    %c0_i32_1 = arith.constant 0 : i32
    %c0_i32_2 = arith.constant 0 : i32
    return %c0_i32, %c0_i32_0, %c0_i32_1 : i32, i32, i32
  }
  func.func @transform_2(%arg0: i32, %arg1: memref<2xi32, #tpu.memory_space<smem>>) -> (i32, i32, i32) {
    %c0_i32 = arith.constant 0 : i32
    %c0_i32_0 = arith.constant 0 : i32
    %c0_i32_1 = arith.constant 0 : i32
    %c0_i32_2 = arith.constant 0 : i32
    return %c0_i32, %c0_i32_0, %c0_i32_1 : i32, i32, i32
  }
  func.func @transform_3(%arg0: i32, %arg1: memref<2xi32, #tpu.memory_space<smem>>) -> (i32, i32, i32) {
    %c0_i32 = arith.constant 0 : i32
    %c0_i32_0 = arith.constant 0 : i32
    %c0_i32_1 = arith.constant 0 : i32
    %c0_i32_2 = arith.constant 0 : i32
    return %c0_i32, %c0_i32_0, %c0_i32_1 : i32, i32, i32
  }
  func.func @transform_4(%arg0: i32, %arg1: memref<2xi32, #tpu.memory_space<smem>>) -> (i32, i32, i32) {
    %c0_i32 = arith.constant 0 : i32
    %c0_i32_0 = arith.constant 0 : i32
    %c0_i32_1 = arith.constant 0 : i32
    %c0_i32_2 = arith.constant 0 : i32
    return %c0_i32, %c0_i32_0, %c0_i32_1 : i32, i32, i32
  }
  func.func @transform_5(%arg0: i32, %arg1: memref<2xi32, #tpu.memory_space<smem>>) -> (i32, i32, i32) {
    %c0_i32 = arith.constant 0 : i32
    %c0_i32_0 = arith.constant 0 : i32
    %c0_i32_1 = arith.constant 0 : i32
    %c0_i32_2 = arith.constant 0 : i32
    return %c0_i32, %c0_i32_0, %c0_i32_1 : i32, i32, i32
  }
  func.func @transform_6(%arg0: i32, %arg1: memref<2xi32, #tpu.memory_space<smem>>) -> (i32, i32, i32) {
    %c0_i32 = arith.constant 0 : i32
    %c0_i32_0 = arith.constant 0 : i32
    %c0_i32_1 = arith.constant 0 : i32
    %c0_i32_2 = arith.constant 0 : i32
    return %c0_i32, %c0_i32_0, %c0_i32_1 : i32, i32, i32
  }
  func.func @transform_7(%arg0: i32, %arg1: memref<2xi32, #tpu.memory_space<smem>>) -> (i32, i32, i32) {
    %c0_i32 = arith.constant 0 : i32
    %c0_i32_0 = arith.constant 0 : i32
    %c0_i32_1 = arith.constant 0 : i32
    %c0_i32_2 = arith.constant 0 : i32
    return %c0_i32, %c0_i32_0, %c0_i32_1 : i32, i32, i32
  }
  func.func @transform_8(%arg0: i32, %arg1: memref<2xi32, #tpu.memory_space<smem>>) -> (i32, i32, i32) {
    %c0_i32 = arith.constant 0 : i32
    %c0_i32_0 = arith.constant 0 : i32
    %c0_i32_1 = arith.constant 0 : i32
    %c0_i32_2 = arith.constant 0 : i32
    return %c0_i32, %c0_i32_0, %c0_i32_1 : i32, i32, i32
  }
  func.func @transform_9(%arg0: i32, %arg1: memref<2xi32, #tpu.memory_space<smem>>) -> (i32, i32, i32) {
    %c0_i32 = arith.constant 0 : i32
    %c0_i32_0 = arith.constant 0 : i32
    %c0_i32_1 = arith.constant 0 : i32
    %c0_i32_2 = arith.constant 0 : i32
    return %c0_i32, %c0_i32_0, %c0_i32_1 : i32, i32, i32
  }
  func.func @transform_10(%arg0: i32, %arg1: memref<2xi32, #tpu.memory_space<smem>>) -> (i32, i32, i32) {
    %c0_i32 = arith.constant 0 : i32
    %c0_i32_0 = arith.constant 0 : i32
    %c0_i32_1 = arith.constant 0 : i32
    %c0_i32_2 = arith.constant 0 : i32
    return %c0_i32, %c0_i32_0, %c0_i32_1 : i32, i32, i32
  }
  func.func @transform_11(%arg0: i32, %arg1: memref<2xi32, #tpu.memory_space<smem>>) -> (i32, i32, i32) {
    %c0_i32 = arith.constant 0 : i32
    %c0_i32_0 = arith.constant 0 : i32
    %c0_i32_1 = arith.constant 0 : i32
    %c0_i32_2 = arith.constant 0 : i32
    return %c0_i32, %c0_i32_0, %c0_i32_1 : i32, i32, i32
  }
  func.func @transform_12(%arg0: i32, %arg1: memref<2xi32, #tpu.memory_space<smem>>) -> (i32, i32, i32) {
    %c0_i32 = arith.constant 0 : i32
    %c0_i32_0 = arith.constant 0 : i32
    %c0_i32_1 = arith.constant 0 : i32
    %c0_i32_2 = arith.constant 0 : i32
    return %c0_i32, %c0_i32_0, %c0_i32_1 : i32, i32, i32
  }
  func.func @transform_13(%arg0: i32, %arg1: memref<2xi32, #tpu.memory_space<smem>>) -> (i32, i32) {
    %c0_i32 = arith.constant 0 : i32
    %c0_i32_0 = arith.constant 0 : i32
    %c0_i32_1 = arith.constant 0 : i32
    return %c0_i32, %c0_i32_0 : i32, i32
  }
  func.func @transform_14(%arg0: i32, %arg1: memref<2xi32, #tpu.memory_space<smem>>) -> (i32, i32) {
    %c0_i32 = arith.constant 0 : i32
    %c0_i32_0 = arith.constant 0 : i32
    %c0_i32_1 = arith.constant 0 : i32
    return %c0_i32, %c0_i32_0 : i32, i32
  }
  func.func @transform_15(%arg0: i32, %arg1: memref<2xi32, #tpu.memory_space<smem>>) -> (i32, i32) {
    %c0_i32 = arith.constant 0 : i32
    %c0_i32_0 = arith.constant 0 : i32
    return %arg0, %c0_i32 : i32, i32
  }
  func.func @transform_16(%arg0: i32, %arg1: memref<2xi32, #tpu.memory_space<smem>>) -> (i32, i32, i32) {
    %c0_i32 = arith.constant 0 : i32
    %c0_i32_0 = arith.constant 0 : i32
    %c0_i32_1 = arith.constant 0 : i32
    return %arg0, %c0_i32, %c0_i32_0 : i32, i32, i32
  }
}

</mosaic_0001>

<bundles_post_ra>
// kernel: rgt_forward.1
= control target key start
LH: loop header
LB: loop body
LE: loop exit
PB: predicated region body
PF: predicated region fallthrough
CT: control target
= control target key end

     0   :  { %s3739_s0 = inlined_call_operand.vmem [shape: s32[2], index: 0, kind: input, shape index: {}]   ;;  %s3740_s1 = inlined_call_operand.vmem [shape: f32[16,32], index: 1, kind: input, shape index: {}]   ;;  %s3741_s2 = inlined_call_operand.vmem [shape: f32[2,32,96], index: 2, kind: input, shape index: {}]   ;;  %s3742_s3 = inlined_call_operand.vmem [shape: f32[2,1,96], index: 3, kind: input, shape index: {}]   ;;  %s3743_s4 = inlined_call_operand.vmem [shape: f32[2,32,32], index: 4, kind: input, shape index: {}]   ;;  %s3744_s5 = inlined_call_operand.vmem [shape: f32[2,1,32], index: 5, kind: input, shape index: {}]   ;;  %s3745_s6 = inlined_call_operand.vmem [shape: f32[2,1,32], index: 6, kind: input, shape index: {}]   ;;  %s3746_s7 = inlined_call_operand.vmem [shape: f32[2,1,32], index: 7, kind: input, shape index: {}]   ;;  %s3747_s8 = inlined_call_operand.vmem [shape: f32[2,1,32], index: 8, kind: input, shape index: {}]   ;;  %s3748_s9 = inlined_call_operand.vmem [shape: f32[2,1,32], index: 9, kind: input, shape index: {}]   ;;  %s3749_s10 = inlined_call_operand.vmem [shape: f32[2,32,128], index: 10, kind: input, shape index: {}]   ;;  %s3750_s11 = inlined_call_operand.vmem [shape: f32[2,1,128], index: 11, kind: input, shape index: {}]   ;;  %s3751_s12 = inlined_call_operand.vmem [shape: f32[2,128,32], index: 12, kind: input, shape index: {}]   ;;  %s3752_s13 = inlined_call_operand.vmem [shape: f32[2,1,32], index: 13, kind: input, shape index: {}]   ;;  %s3753_s14 = inlined_call_operand.vmem [shape: f32[1,32], index: 14, kind: input, shape index: {}]   ;;  %s3754_s15 = inlined_call_operand.vmem [shape: f32[1,32], index: 15, kind: input, shape index: {}]   ;;  %s3755_s16 = inlined_call_operand.hbm [shape: f32[16,32], index: 16, kind: output, shape index: {0}]   ;;  %s3756_s17 = inlined_call_operand.vmem [shape: f32[2,1,32], index: 17, kind: output, shape index: {1}]  }
   0x1   :  { %3775 = sst [smem:[#allocation11_spill]] %s3739_s0 }
   0x2   :  { %3776 = sst [smem:[#allocation12_spill]] %s3740_s1 }
   0x3   :  { %3777 = sst [smem:[#allocation13_spill]] %s3741_s2 }
   0x4   :  { %3778 = sst [smem:[#allocation14_spill]] %s3742_s3 }
   0x5   :  { %3779 = sst [smem:[#allocation15_spill]] %s3743_s4 }
   0x6   :  { %3780 = sst [smem:[#allocation16_spill]] %s3744_s5 }
   0x7   :  { %3781 = sst [smem:[#allocation17_spill]] %s3745_s6 }
   0x8   :  { %3782 = sst [smem:[#allocation18_spill]] %s3750_s11 }
   0x9   :  { %s3783_s26 = sld [smem:[#allocation11_spill]] }
   0xf   :  { %s23_s11 = sshll.u32 %s3783_s26, 4  ;;  %s24_s11 = int_to_ptr.vmem [resolvable:$true] %s23_s11 }
  0x10   :  { %s2952_s27 = scalar_lea.vmem %s24_s11, 16  ;;  %p2957_p1 = scmp.lt.s32.totalorder %s24_s11, %s24_s11 }
  0x11   :  { %p2953_p0 = scmp.ne.s32.totalorder %s24_s11, %s2952_s27  ;;  %p2958_p2 = scmp.lt.s32.totalorder %s2952_s27, %s2952_s27 }
  0x13   :  { %p2959_p3 = por %p2958_p2, %p2957_p1 }
  0x15   :  { %p2960_p4 = pnand %p2959_p3, %p2953_p0 }
  0x17   :  { %2963 = shalt.err (!%p2960_p4)  }
  0x18   :  { %s3028_s28 = smov [#allocation3]  }
  0x19   :  { %26 = dma.vmem_to_smem %s24_s11, 16, %s3028_s28, [#allocation2] }
  0x1a   :  { %3006 = dma.done.wait [#allocation2], 16 }
  0x1b   :  { %3007 = vsyncadd [#allocation2], 4294967280 }
  0x1c   :  { %28 = sfence }
  0x1d   :  { %29 = vsyncpa [#allocation5], 0 }
  0x1e   :  { %31 = vsyncpa [#allocation5 + $0x1], 0  ;;  %s3139_s29 = smov 0   ;;  %s3141_s0 = smov 0  }
  0x1f   :  { %s3143_s30 = smov 0   ;;  %s3145_s18 = smov 0  }
  0x20 LB: > { %3784 = sst [smem:[#allocation8_spill]] %s3022_s30  ;;  %s3160_s11 = sadd.s32 4294967295, %s3026_s18   ;;  %s3026_s18 = sphi %s3145_s18, %s3811_s18   ;;  %s3022_s30 = sphi %s3143_s30, %s3813_s30   ;;  %s3018_s0 = sphi %s3141_s0, %s3815_s0   ;;  %s3014_s29 = sphi %s3139_s29, %s3814_s29  }
  0x21   : > { %s2436_s19 = sadd.s32 4294967294, %s3026_s18   ;;  %s3164_s1 = sadd.s32 1, %s3026_s18  }
  0x22   : > { %3785 = sst [smem:[#allocation9_spill]] %s3164_s1  ;;  %s364_s20 = sadd.s32 1, %s3022_s30 }
  0x23   : > { %s361_s21 = ssub.s32 %s3026_s18, %s3164_s1  ;;  %p374_p5 = scmp.ne.s32.totalorder %s3022_s30, %s3018_s0 }
  0x24   : > { %p362_p6 = scmp.eq.s32.totalorder %s361_s21, 0  ;;  %p375_p7 = scmp.eq.s32.totalorder %s3160_s11, 1 }
  0x25   : > { %p380_p8 = scmp.ne.s32.totalorder %s3018_s0, %s3014_s29  ;;  %p381_p9 = scmp.eq.s32.totalorder %s2436_s19, 1 }
  0x26   : > { %s3175_s22 = scalar_select %p362_p6, %s3022_s30, %s364_s20  }
  0x27   : > { %p3177_p10 = por %p375_p7, %p374_p5  ;;  %p3181_p11 = por %p381_p9, %p380_p8 }
  0x28   : > { %3786 = sst [smem:[#allocation10_spill]] %s3175_s22  ;;  %p2439_p12 = scmp.ge.s32.totalorder %s3026_s18, 1 }
  0x29   : > { %p474_p13 = scmp.lt.s32.totalorder %s3026_s18, 3 }
  0x2b   : > { %p475_p0 = pnand %p2439_p12, %p474_p13 }
  0x2c   : > { %p526_p1 = scmp.lt.s32.totalorder (!%p475_p0), %s3160_s11, 1  ;;  %s3789_s19 = sld [smem:[#allocation12_spill]] (!%p475_p0) }
  0x2d   : > { %478 = sbr.rel (%p475_p0) target bundleno = 5760 (0x1680), region = 80  ;;  %s3790_s2 = sld [smem:[#allocation13_spill]] (!%p475_p0) }
  0x2e   : > { %s3791_s6 = sld [smem:[#allocation17_spill]] (!%p475_p0)  ;;  %s3768_s21 = smov (!%p475_p0), 96  }
  0x2f   : > { %s3792_s3 = sld [smem:[#allocation14_spill]] (!%p475_p0)  ;;  %s3759_s27 = smov (!%p475_p0), 80  }
  0x30   : > { %s3765_s28 = smov (!%p475_p0), 112   ;;  %s3760_s22 = smov (!%p475_p0), 104  }
  0x31   : > { %s3793_s4 = sld [smem:[#allocation15_spill]] (!%p475_p0)  ;;  %s3803_s1 = smov (!%p475_p0), 80  }
  0x32   : > { %s3189_s25 = scalar_select %p526_p1, %s3160_s11, 1  ;;  %vm537_vm0 = vcmask 261120   ;;  %v3029_v8 = vmov 0.0   ;;  %vm3030_vm1 = vmmov 0   ;;  %v2443_v18 = vld [vmem:[%s3746_s7] ss:$0 sm:$0xff] }
  0x33   : > { %v569_v7 = vld [vmem:[%s3790_s2 + $0x18] sm:$0xff]  ;;  %2618 = vmatprep.subr.mxu0 %v3029_v8  ;;  %v568_v9 = vld [vmem:[%s3790_s2 + $0x10] sm:$0xff]  ;;  %2626 = vmatprep.mubr.msk.f32.mxu0 %vm3030_vm1, %v3029_v8  ;;  %v567_v10 = vld [vmem:[%s3790_s2 + $0x8] sm:$0xff]  ;;  %vm654_vm2 = vcmask 64512   ;;  %vm718_vm3 = vcmask 1043456   ;;  %vm1105_vm4 = vcmask 130048  }
  0x34   : > { %s2441_s26 = sshll.u32 %s3189_s25, 3  ;;  %2619 = vmatpush3.msra.mxu0 %v569_v7  ;;  %2629 = vmatprep.subr.bf16.mxu1 %v3029_v8  ;;  %v566_v11 = vld [vmem:[%s3790_s2] sm:$0xff]  ;;  %vm1107_vm5 = vcmask 195584   ;;  %s3794_s5 = sld [smem:[#allocation16_spill]] }
  0x35   : > { %s529_s20 = scalar_lea.vmem %s3789_s19, %s2441_s26  ;;  %2620 = vmatprep.subr.mxu0 %v3029_v8  ;;  %2631 = vmatprep.mubr.msk.bf16.mxu1 %vm3030_vm1, %v3029_v8  ;;  %v2442_v16 = vld [vmem:[%s3791_s6] ss:$0 sm:$0xff]  ;;  %s3767_s26 = smov 88  }
  0x36   : > { %v3195_v0 = vld [vmem:[%s529_s20] sm:$0xff]  ;;  %2621 = vmatpush3.msra.mxu0 %v568_v9  ;;  %s3766_s20 = smov 120   ;;  %s3758_s19 = smov 72  }
  0x37   : > { %v538_v1 = vsel %vm537_vm0, %v3195_v0, 0.0  ;;  %2622 = vmatprep.subr.mxu0 %v3029_v8  ;;  %v2444_v21 = vld [vmem:[%s3792_s3] ss:$0 sm:$0xff]  ;;  %s3795_s30 = sld [smem:[#allocation18_spill]] }
  0x38   : > { %539 = vadd.xlane.f32.xlu0 %v538_v1  ;;  %2623 = vmatpush3.msra.mxu0 %v567_v10 }
  0x39   : > { %2624 = vmatprep.subr.mxu0 %v3029_v8 }
  0x3a   : > { %2625 = vmatpush3.msra.mxu0 %v566_v11 }
  0x3b   : > { %2635 = vmatprep.subr.bf16.mxu0 %v3029_v8 }
  0xc1   : > { %v540_v2 = vpop.xlane.xlu0 %539 }
  0xc2   : > { %v542_v3 = vmul.f32 0.03125, %v540_v2 }
  0xc4   : > { %v543_v4 = vsub.f32 %v3195_v0, %v542_v3 }
  0xc6   : > { %v544_v5 = vmul.f32 %v543_v4, %v543_v4 }
  0xc8   : > { %v545_v6 = vsel %vm537_vm0, %v544_v5, 0.0 }
  0xc9   : > { %546 = vadd.xlane.f32.xlu0 %v545_v6 }
 0x152   : > { %v547_v12 = vpop.xlane.xlu0 %546 }
 0x153   : > { %v548_v13 = vmul.f32 0.03125, %v547_v12 }
 0x155   : > { %v549_v14 = vadd.f32 1e-05, %v548_v13 }
 0x157   : > { %2906 = vrsqrt.f32 %v549_v14 }
 0x164   : > { %v2907_v15 = vpop.eup %2906 }
 0x165   : > { %v551_v17 = vmul.f32 %v2907_v15, %v543_v4 }
 0x167   : > { %v558_v19 = vmul.f32 %v2442_v16, %v551_v17 }
 0x169   : > { %v565_v20 = vadd.f32 %v2443_v18, %v558_v19 }
 0x16b   : > { %2627 = vmatmul.mubr.msk.f32.vlgmr.msra.gmra.mxu0 %vm537_vm0, %v565_v20 }
 0x16c   : > { %2637 = vmatprep.mubr.msk.bf16.mxu0 %vm3030_vm1, %v3029_v8 }
 0x22b   : > { %v646_v22 = vpop.f32.mrf.mxu0 }
 0x22c   : > { %v647_v23 = vadd.f32 %v2444_v21, %v646_v22 }
 0x22d   : > { %v2628_v24 = vpop.f32.mrf.mxu0 }
 0x22e   : > { %v3235_v25 = vpack.c.bf16 %v647_v23, %v647_v23 }
 0x230   : > { %762 = vrot.lane.b32.xlu0 %v3235_v25, %s3766_s20  ;;  %652 = vrot.lane.b32.xlu1 %v3235_v25, %s3768_s21  ;;  %s3772_s20 = smov 16   ;;  %s3771_s21 = smov 24  }
 0x234   : > { %764 = vrot.lane.b32.xlu1 %v3235_v25, %s3767_s26  ;;  %s3796_s26 = smov %s3795_s30 }
 0x238   : > { %874 = vrot.lane.b32.xlu1 %v3235_v25, %s3759_s27  ;;  %s3763_s27 = smov 56  }
 0x23c   : > { %872 = vrot.lane.b32.xlu1 %v3235_v25, %s3765_s28  ;;  %s3798_s28 = smov 88  }
 0x240   : > { %984 = vrot.lane.b32.xlu1 %v3235_v25, %s3758_s19  ;;  %s3761_s19 = smov 64  }
 0x244   : > { %982 = vrot.lane.b32.xlu1 %v3235_v25, %s3760_s22  ;;  %s3764_s22 = smov 48  }
 0x2a2   : > { %v653_v26 = vpop.permute.xlu1 %652  ;;  %v763_v31 = vpop.permute.xlu0 %762 }
 0x2a3   : > { %v659_v27 = vsel %vm654_vm2, %v653_v26, 0 }
 0x2a4   : > { %2630 = vmatpush3.bf16.xpose.msra.mxu1 %v659_v27 }
 0x2a5   : > { %2641 = vmatprep.subr.bf16.mxu1 %v3029_v8 }
 0x2a6   : > { %v765_v28 = vpop.permute.xlu1 %764 }
 0x2a7   : > { %v770_v29 = vsel %vm654_vm2, %v765_v28, 0 }
 0x2aa   : > { %v875_v30 = vpop.permute.xlu1 %874 }
 0x2ab   : > { %2632 = vmatmul.mubr.msk.bf16.vlgmr.msra.gmra.mxu1 %vm654_vm2, %v3235_v25  ;;  %v880_v33 = vsel %vm654_vm2, %v875_v30, 0 }
 0x2ac   : > { %2642 = vmatpush3.bf16.xpose.msra.mxu1 %v770_v29  ;;  %2643 = vmatprep.mubr.msk.bf16.mxu1 %vm3030_vm1, %v3029_v8 }
 0x2ad   : > { %2653 = vmatprep.subr.bf16.mxu1 %v3029_v8 }
 0x2ae   : > { %v873_v32 = vpop.permute.xlu1 %872 }
 0x2b2   : > { %v985_v34 = vpop.permute.xlu1 %984 }
 0x2b3   : > { %2644 = vmatmul.mubr.msk.bf16.vlgmr.msra.gmra.mxu1 %vm654_vm2, %v763_v31  ;;  %v990_v35 = vsel %vm654_vm2, %v985_v34, 0 }
 0x2b4   : > { %2654 = vmatpush3.bf16.xpose.msra.mxu1 %v880_v33  ;;  %2655 = vmatprep.mubr.msk.bf16.mxu1 %vm3030_vm1, %v3029_v8 }
 0x2b5   : > { %2665 = vmatprep.subr.bf16.mxu1 %v3029_v8 }
 0x2b6   : > { %v983_v36 = vpop.permute.xlu1 %982 }
 0x2bb   : > { %2656 = vmatmul.mubr.msk.bf16.vlgmr.msra.gmra.mxu1 %vm654_vm2, %v873_v32 }
 0x2bc   : > { %2666 = vmatpush3.bf16.xpose.msra.mxu1 %v990_v35  ;;  %2667 = vmatprep.mubr.msk.bf16.mxu1 %vm3030_vm1, %v3029_v8 }
 0x2bd   : > { %2677 = vmatprep.subr.mxu1 %v3029_v8 }
 0x2c3   : > { %2668 = vmatmul.mubr.msk.bf16.vlgmr.msra.gmra.mxu1 %vm654_vm2, %v983_v36 }
 0x2c4   : > { %2685 = vmatprep.mubr.msk.f32.mxu1 %vm3030_vm1, %v3029_v8 }
 0x36b   : > { %v695_v37 = vpop.f32.mrf.mxu1 }
 0x36c   : > { %v701_v38 = vsel %vm654_vm2, %v695_v37, -inf }
 0x36d   : > { %702 = vmax.xlane.f32.xlu1 %v701_v38  ;;  %v2633_v39 = vpop.f32.mrf.mxu1 }
 0x36f   : > { %v698_v40 = vpop.f32.mrf.mxu1 }
 0x371   : > { %v2634_v41 = vpop.f32.mrf.mxu1 }
 0x373   : > { %v806_v42 = vpop.f32.mrf.mxu1 }
 0x374   : > { %v812_v43 = vsel %vm654_vm2, %v806_v42, -inf }
 0x375   : > { %813 = vmax.xlane.f32.xlu0 %v812_v43  ;;  %v2645_v44 = vpop.f32.mrf.mxu1 }
 0x377   : > { %v809_v45 = vpop.f32.mrf.mxu1 }
 0x379   : > { %v2646_v46 = vpop.f32.mrf.mxu1 }
 0x37b   : > { %v916_v47 = vpop.f32.mrf.mxu1 }
 0x37c   : > { %v922_v48 = vsel %vm654_vm2, %v916_v47, -inf }
 0x37d   : > { %923 = vmax.xlane.f32.xlu1 %v922_v48  ;;  %v2657_v49 = vpop.f32.mrf.mxu1  ;;  %v1111_v48 = vld [vmem:[%s3793_s4 + $0x10] sm:$0xff] }
 0x37e   : > { %v1110_v49 = vld [vmem:[%s3793_s4 + $0x8] sm:$0xff] }
 0x37f   : > { %v919_v50 = vpop.f32.mrf.mxu1 }
 0x380   : > { %v1109_v50 = vld [vmem:[%s3793_s4] sm:$0xff] }
 0x381   : > { %v2658_v51 = vpop.f32.mrf.mxu1 }
 0x383   : > { %v1026_v52 = vpop.f32.mrf.mxu1 }
 0x384   : > { %v1032_v53 = vsel %vm654_vm2, %v1026_v52, -inf }
 0x385   : > { %1033 = vmax.xlane.f32.xlu0 %v1032_v53  ;;  %v2669_v54 = vpop.f32.mrf.mxu1 }
 0x387   : > { %v1029_v55 = vpop.f32.mrf.mxu1 }
 0x389   : > { %v2670_v56 = vpop.f32.mrf.mxu1 }
 0x3f6   : > { %v703_v57 = vpop.xlane.xlu1 %702 }
 0x3f7   : > { %v704_v58 = vsub.f32 %v695_v37, %v703_v57 }
 0x3f9   : > { %v705_v59 = vmul.f32 1.442695, %v704_v58 }
 0x3fb   : > { %2908 = vpow2.f32 %v705_v59 }
 0x3fe   : > { %v814_v60 = vpop.xlane.xlu0 %813 }
 0x3ff   : > { %v815_v61 = vsub.f32 %v806_v42, %v814_v60 }
 0x401   : > { %v816_v62 = vmul.f32 1.442695, %v815_v61 }
 0x403   : > { %2910 = vpow2.f32 %v816_v62 }
 0x406   : > { %v924_v10 = vpop.xlane.xlu1 %923 }
 0x407   : > { %v925_v11 = vsub.f32 %v916_v47, %v924_v10  ;;  %v1112_v47 = vld [vmem:[%s3793_s4 + $0x18] sm:$0xff] }
 0x408   : > { %v2909_v63 = vpop.eup %2908  ;;  %2678 = vmatpush3.msra.mxu1 %v1112_v47 }
 0x409   : > { %v707_v1 = vsel %vm654_vm2, %v2909_v63, 0.0  ;;  %v926_v12 = vmul.f32 1.442695, %v925_v11  ;;  %2679 = vmatprep.subr.mxu1 %v3029_v8 }
 0x40a   : > { %708 = vadd.xlane.f32.xlu1 %v707_v1  ;;  %2680 = vmatpush3.msra.mxu1 %v1111_v48 }
 0x40b   : > { %2681 = vmatprep.subr.mxu1 %v3029_v8 }
 0x40c   : > { %2682 = vmatpush3.msra.mxu1 %v1110_v49 }
 0x40d   : > { %2683 = vmatprep.subr.mxu1 %v3029_v8 }
 0x40e   : > { %v1034_v2 = vpop.xlane.xlu0 %1033  ;;  %2684 = vmatpush3.msra.mxu1 %v1109_v50 }
 0x40f   : > { %v1035_v3 = vsub.f32 %v1026_v52, %v1034_v2  ;;  %2699 = vmatprep.subr.mxu1 %v3029_v8  ;;  %v2454_v2 = vld [vmem:[%s3794_s5] ss:$0 sm:$0xff] }
 0x410   : > { %v2911_v4 = vpop.eup %2910 }
 0x411   : > { %v1036_v5 = vmul.f32 1.442695, %v1035_v3  ;;  %v818_v6 = vsel %vm654_vm2, %v2911_v4, 0.0 }
 0x412   : > { %819 = vadd.xlane.f32.xlu0 %v818_v6 }
 0x413   : > { %2912 = vpow2.f32 %v1036_v5 }
 0x414   : > { %2914 = vpow2.f32 %v926_v12 }
 0x41b   : > { %713 = vrot.lane.b32.xlu1 %v3235_v25, %s3761_s19  ;;  %s3762_s19 = smov 40  }
 0x420   : > { %v2913_v7 = vpop.eup %2912 }
 0x421   : > { %v1038_v9 = vsel %vm654_vm2, %v2913_v7, 0.0  ;;  %v2915_v13 = vpop.eup %2914 }
 0x422   : > { %1039 = vadd.xlane.f32.xlu0 %v1038_v9  ;;  %v928_v14 = vsel %vm654_vm2, %v2915_v13, 0.0 }
 0x438   : > { %824 = vrot.lane.b32.xlu0 %v3235_v25, %s3763_s27  ;;  %s3797_s27 = smov 96  }
 0x43f   : > { %929 = vadd.xlane.f32.xlu1 %v928_v14  ;;  %v1226_v14 = vld [vmem:[%s3749_s10 + $0x18] sm:$0xff] }
 0x450   : > { %934 = vrot.lane.b32.xlu1 %v3235_v25, %s3764_s22  ;;  %s3800_s22 = smov 112  }
 0x454   : > { %1044 = vrot.lane.b32.xlu1 %v3235_v25, %s3762_s19  ;;  %s3769_s19 = smov 8  }
 0x493   : > { %v709_v15 = vpop.xlane.xlu1 %708 }
 0x494   : > { %2916 = vrcp.f32 %v709_v15  ;;  %v1224_v15 = vld [vmem:[%s3749_s10 + $0x8] sm:$0xff] }
 0x497   : > { %v714_v16 = vpop.permute.xlu1 %713 }
 0x498   : > { %v720_v17 = vsel %vm718_vm3, %v714_v16, 0  ;;  %v1223_v16 = vld [vmem:[%s3749_s10] sm:$0xff] }
 0x499   : > { %2636 = vmatpush3.bf16.msra.mxu0 %v720_v17 }
 0x49a   : > { %2647 = vmatprep.subr.bf16.mxu0 %v3029_v8 }
 0x49b   : > { %v820_v18 = vpop.xlane.xlu0 %819 }
 0x49c   : > { %2918 = vrcp.f32 %v820_v18 }
 0x4a1   : > { %v2917_v19 = vpop.eup %2916 }
 0x4a2   : > { %v711_v20 = vmul.f32 %v2917_v19, %v2909_v63 }
 0x4a4   : > { %v712_v21 = vpack.c.bf16 %v711_v20, %v711_v20 }
 0x4a6   : > { %2638 = vmatmul.mubr.msk.bf16.vlgmr.msra.gmra.mxu0 %vm654_vm2, %v712_v21  ;;  %v2456_v21 = vld [vmem:[%s3747_s8] ss:$0 sm:$0xff] }
 0x4a7   : > { %2649 = vmatprep.mubr.msk.bf16.mxu0 %vm3030_vm1, %v3029_v8 }
 0x4a9   : > { %v2919_v22 = vpop.eup %2918 }
 0x4aa   : > { %v822_v24 = vmul.f32 %v2919_v22, %v2911_v4 }
 0x4ab   : > { %v1040_v23 = vpop.xlane.xlu0 %1039 }
 0x4ac   : > { %v823_v27 = vpack.c.bf16 %v822_v24, %v822_v24 }
 0x4af   : > { %v825_v25 = vpop.permute.xlu0 %824 }
 0x4b0   : > { %v830_v26 = vsel %vm718_vm3, %v825_v25, 0 }
 0x4b1   : > { %2648 = vmatpush3.bf16.msra.mxu0 %v830_v26  ;;  %v1331_v26 = vld [vmem:[%s3751_s12 + $0x78] sm:$0xff] }
 0x4b2   : > { %2659 = vmatprep.subr.bf16.mxu0 %v3029_v8 }
 0x4b4   : > { %2650 = vmatmul.mubr.msk.bf16.vlgmr.msra.gmra.mxu0 %vm654_vm2, %v823_v27  ;;  %v1330_v27 = vld [vmem:[%s3751_s12 + $0x70] sm:$0xff] }
 0x4b5   : > { %2661 = vmatprep.mubr.msk.bf16.mxu0 %vm3030_vm1, %v3029_v8 }
 0x4c8   : > { %v930_v28 = vpop.xlane.xlu1 %929 }
 0x4c9   : > { %2920 = vrcp.f32 %v930_v28  ;;  %v1329_v28 = vld [vmem:[%s3751_s12 + $0x68] sm:$0xff] }
 0x4ca   : > { %2922 = vrcp.f32 %v1040_v23  ;;  %v2457_v23 = vld [vmem:[%s3748_s9] ss:$0 sm:$0xff] }
 0x4cc   : > { %v935_v29 = vpop.permute.xlu1 %934 }
 0x4cd   : > { %v940_v30 = vsel %vm718_vm3, %v935_v29, 0  ;;  %v1328_v29 = vld [vmem:[%s3751_s12 + $0x60] sm:$0xff] }
 0x4ce   : > { %2660 = vmatpush3.bf16.msra.mxu0 %v940_v30  ;;  %v1327_v30 = vld [vmem:[%s3751_s12 + $0x58] sm:$0xff] }
 0x4cf   : > { %2671 = vmatprep.subr.bf16.mxu0 %v3029_v8 }
 0x4d0   : > { %v1045_v33 = vpop.permute.xlu1 %1044 }
 0x4d1   : > { %v1050_v36 = vsel %vm718_vm3, %v1045_v33, 0  ;;  %v1324_v33 = vld [vmem:[%s3751_s12 + $0x40] sm:$0xff] }
 0x4d6   : > { %v2921_v31 = vpop.eup %2920 }
 0x4d7   : > { %v932_v32 = vmul.f32 %v2921_v31, %v2915_v13  ;;  %v2923_v35 = vpop.eup %2922  ;;  %v1326_v31 = vld [vmem:[%s3751_s12 + $0x50] sm:$0xff] }
 0x4d8   : > { %v1042_v37 = vmul.f32 %v2923_v35, %v2913_v7  ;;  %v1322_v35 = vld [vmem:[%s3751_s12 + $0x30] sm:$0xff] }
 0x4d9   : > { %v933_v34 = vpack.c.bf16 %v932_v32, %v932_v32  ;;  %v1325_v32 = vld [vmem:[%s3751_s12 + $0x48] sm:$0xff] }
 0x4da   : > { %v1043_v38 = vpack.c.bf16 %v1042_v37, %v1042_v37  ;;  %v1320_v37 = vld [vmem:[%s3751_s12 + $0x20] sm:$0xff] }
 0x4db   : > { %2662 = vmatmul.mubr.msk.bf16.vlgmr.msra.gmra.mxu0 %vm654_vm2, %v933_v34  ;;  %v1323_v34 = vld [vmem:[%s3751_s12 + $0x38] sm:$0xff] }
 0x4dc   : > { %2672 = vmatpush3.bf16.msra.mxu0 %v1050_v36  ;;  %2673 = vmatprep.mubr.msk.bf16.mxu0 %vm3030_vm1, %v3029_v8  ;;  %v1321_v36 = vld [vmem:[%s3751_s12 + $0x28] sm:$0xff] }
 0x4dd   : > { %2688 = vmatprep.subr.mxu0 %v3029_v8 }
 0x4e3   : > { %2674 = vmatmul.mubr.msk.bf16.vlgmr.msra.gmra.mxu0 %vm654_vm2, %v1043_v38  ;;  %v1319_v38 = vld [vmem:[%s3751_s12 + $0x18] sm:$0xff] }
 0x4e4   : > { %2696 = vmatprep.mubr.msk.f32.mxu0 %vm3030_vm1, %v3029_v8  ;;  %2689 = vmatpush3.msra.mxu0 %v1226_v14  ;;  %v2464_v14 = vld [vmem:[%s3746_s7 + $0x1] ss:$0 sm:$0xff] }
 0x4e5   : > { %2690 = vmatprep.subr.mxu0 %v3029_v8 }
 0x566   : > { %v756_v39 = vpop.f32.mrf.mxu0 }
 0x568   : > { %v2639_v40 = vpop.f32.mrf.mxu0 }
 0x569   : > { %v1317_v40 = vld [vmem:[%s3751_s12 + $0x8] sm:$0xff] }
 0x56a   : > { %v759_v41 = vpop.f32.mrf.mxu0 }
 0x56b   : > { %v1316_v41 = vld [vmem:[%s3751_s12] sm:$0xff] }
 0x56c   : > { %v2640_v42 = vpop.f32.mrf.mxu0 }
 0x56d   : > { %v2458_v42 = vld [vmem:[%s3795_s30] ss:$0 sm:$0xff]  ;;  %s3804_s30 = smov 72  }
 0x574   : > { %v866_v43 = vpop.f32.mrf.mxu0 }
 0x575   : > { %1093 = vrot.lane.b32.xlu0 %v866_v43, %s3769_s19  ;;  %s3799_s19 = smov 120  }
 0x576   : > { %v2651_v44 = vpop.f32.mrf.mxu0 }
 0x578   : > { %v869_v45 = vpop.f32.mrf.mxu0 }
 0x57a   : > { %v2652_v46 = vpop.f32.mrf.mxu0 }
 0x59b   : > { %v976_v51 = vpop.f32.mrf.mxu0 }
 0x59c   : > { %1097 = vrot.lane.b32.xlu1 %v976_v51, %s3772_s20  ;;  %s3801_s20 = smov 104  }
 0x59d   : > { %v2663_v52 = vpop.f32.mrf.mxu0 }
 0x59f   : > { %v979_v53 = vpop.f32.mrf.mxu0 }
 0x5a1   : > { %v2664_v54 = vpop.f32.mrf.mxu0 }
 0x5a3   : > { %v1086_v55 = vpop.f32.mrf.mxu0 }
 0x5a4   : > { %1101 = vrot.lane.b32.xlu0 %v1086_v55, %s3771_s21  ;;  %v2460_v55 = vld [vmem:[%s3752_s13] ss:$0 sm:$0xff]  ;;  %s3802_s21 = smov 64  }
 0x5a5   : > { %v2675_v56 = vpop.f32.mrf.mxu0 }
 0x5a7   : > { %v1089_v57 = vpop.f32.mrf.mxu0 }
 0x5a9   : > { %v2676_v58 = vpop.f32.mrf.mxu0 }
 0x5e7   : > { %v1094_v59 = vpop.permute.xlu0 %1093 }
 0x5e8   : > { %v1104_v61 = vsel %vm654_vm2, %v756_v39, %v1094_v59  ;;  %v1318_v39 = vld [vmem:[%s3751_s12 + $0x10] sm:$0xff] }
 0x60e   : > { %v1098_v60 = vpop.permute.xlu1 %1097 }
 0x60f   : > { %v1106_v62 = vsel %vm1105_vm4, %v1104_v61, %v1098_v60 }
 0x616   : > { %v1102_v63 = vpop.permute.xlu0 %1101 }
 0x617   : > { %v1108_v1 = vsel %vm1107_vm5, %v1106_v62, %v1102_v63 }
 0x618   : > { %2686 = vmatmul.mubr.msk.f32.vlgmr.msra.gmra.mxu1 %vm537_vm0, %v1108_v1 }
 0x619   : > { %2731 = vmatprep.mubr.msk.f32.mxu1 %vm3030_vm1, %v3029_v8  ;;  %2700 = vmatpush3.msra.mxu1 %v1331_v26 }
 0x61a   : > { %2701 = vmatprep.subr.mxu1 %v3029_v8 }
 0x61b   : > { %2702 = vmatpush3.msra.mxu1 %v1330_v27 }
 0x61c   : > { %2703 = vmatprep.subr.mxu1 %v3029_v8 }
 0x61d   : > { %2704 = vmatpush3.msra.mxu1 %v1329_v28 }
 0x61e   : > { %2705 = vmatprep.subr.mxu1 %v3029_v8 }
 0x61f   : > { %2706 = vmatpush3.msra.mxu1 %v1328_v29 }
 0x620   : > { %2707 = vmatprep.subr.mxu1 %v3029_v8 }
 0x621   : > { %2708 = vmatpush3.msra.mxu1 %v1327_v30 }
 0x622   : > { %2709 = vmatprep.subr.mxu1 %v3029_v8 }
 0x623   : > { %2710 = vmatpush3.msra.mxu1 %v1326_v31 }
 0x624   : > { %2711 = vmatprep.subr.mxu1 %v3029_v8 }
 0x625   : > { %2712 = vmatpush3.msra.mxu1 %v1325_v32 }
 0x626   : > { %2713 = vmatprep.subr.mxu1 %v3029_v8 }
 0x627   : > { %2714 = vmatpush3.msra.mxu1 %v1324_v33 }
 0x628   : > { %2715 = vmatprep.subr.mxu1 %v3029_v8 }
 0x629   : > { %2716 = vmatpush3.msra.mxu1 %v1323_v34 }
 0x62a   : > { %2717 = vmatprep.subr.mxu1 %v3029_v8 }
 0x62b   : > { %2718 = vmatpush3.msra.mxu1 %v1322_v35 }
 0x62c   : > { %2719 = vmatprep.subr.mxu1 %v3029_v8 }
 0x62d   : > { %2720 = vmatpush3.msra.mxu1 %v1321_v36 }
 0x62e   : > { %2721 = vmatprep.subr.mxu1 %v3029_v8 }
 0x62f   : > { %2722 = vmatpush3.msra.mxu1 %v1320_v37 }
 0x630   : > { %2723 = vmatprep.subr.mxu1 %v3029_v8 }
 0x631   : > { %2724 = vmatpush3.msra.mxu1 %v1319_v38 }
 0x632   : > { %2725 = vmatprep.subr.mxu1 %v3029_v8 }
 0x633   : > { %2726 = vmatpush3.msra.mxu1 %v1318_v39 }
 0x634   : > { %2727 = vmatprep.subr.mxu1 %v3029_v8 }
 0x635   : > { %2728 = vmatpush3.msra.mxu1 %v1317_v40 }
 0x636   : > { %2729 = vmatprep.subr.mxu1 %v3029_v8 }
 0x637   : > { %2730 = vmatpush3.msra.mxu1 %v1316_v41 }
 0x638   : > { %2745 = vmatprep.subr.bf16.mxu1 %v3029_v8 }
 0x6d8   : > { %v1189_v3 = vpop.f32.mrf.mxu1 }
 0x6d9   : > { %v1190_v4 = vadd.f32 %v2454_v2, %v1189_v3  ;;  %v2468_v3 = vld [vmem:[%s3790_s2 + $0x38] sm:$0xff] }
 0x6da   : > { %v2687_v5 = vpop.f32.mrf.mxu1 }
 0x6db   : > { %v3337_v6 = vadd.f32 %v1190_v4, %v3195_v0  ;;  %v1225_v0 = vld [vmem:[%s3749_s10 + $0x10] sm:$0xff]  ;;  %v2466_v5 = vld [vmem:[%s3790_s2 + $0x28] sm:$0xff] }
 0x6dc   : > { %2691 = vmatpush3.msra.mxu0 %v1225_v0  ;;  %v2467_v4 = vld [vmem:[%s3790_s2 + $0x30] sm:$0xff] }
 0x6dd   : > { %v1196_v7 = vsel %vm537_vm0, %v3337_v6, 0.0  ;;  %2692 = vmatprep.subr.mxu0 %v3029_v8 }
 0x6de   : > { %1197 = vadd.xlane.f32.xlu1 %v1196_v7  ;;  %2693 = vmatpush3.msra.mxu0 %v1224_v15 }
 0x6df   : > { %2694 = vmatprep.subr.mxu0 %v3029_v8 }
 0x6e0   : > { %2695 = vmatpush3.msra.mxu0 %v1223_v16  ;;  %v2470_v16 = vld [vmem:[%s3792_s3 + $0x1] ss:$0 sm:$0xff] }
 0x6e1   : > { %2734 = vmatprep.subr.mxu0 %v3029_v8 }
 0x767   : > { %v1198_v9 = vpop.xlane.xlu1 %1197 }
 0x768   : > { %v1199_v10 = vmul.f32 0.03125, %v1198_v9 }
 0x76a   : > { %v1200_v11 = vsub.f32 %v3337_v6, %v1199_v10 }
 0x76c   : > { %v1201_v12 = vmul.f32 %v1200_v11, %v1200_v11 }
 0x76e   : > { %v1202_v13 = vsel %vm537_vm0, %v1201_v12, 0.0  ;;  %v2463_v12 = vld [vmem:[%s3791_s6 + $0x1] ss:$0 sm:$0xff] }
 0x76f   : > { %1203 = vadd.xlane.f32.xlu0 %v1202_v13 }
 0x7f8   : > { %v1204_v17 = vpop.xlane.xlu0 %1203 }
 0x7f9   : > { %v1205_v18 = vmul.f32 0.03125, %v1204_v17 }
 0x7fb   : > { %v1206_v19 = vadd.f32 1e-05, %v1205_v18 }
 0x7fd   : > { %2924 = vrsqrt.f32 %v1206_v19 }
 0x80a   : > { %v2925_v20 = vpop.eup %2924 }
 0x80b   : > { %v1208_v22 = vmul.f32 %v2925_v20, %v1200_v11 }
 0x80d   : > { %v1215_v24 = vmul.f32 %v2456_v21, %v1208_v22 }
 0x80f   : > { %v1222_v25 = vadd.f32 %v2457_v23, %v1215_v24 }
 0x811   : > { %2697 = vmatmul.mubr.msk.f32.vlgmr.msra.gmra.mxu0 %vm537_vm0, %v1222_v25 }
 0x812   : > { %2742 = vmatprep.mubr.msk.f32.mxu0 %vm3030_vm1, %v3029_v8  ;;  %2735 = vmatpush3.msra.mxu0 %v2468_v3 }
 0x813   : > { %2736 = vmatprep.subr.mxu0 %v3029_v8 }
 0x814   : > { %2737 = vmatpush3.msra.mxu0 %v2467_v4 }
 0x815   : > { %2738 = vmatprep.subr.mxu0 %v3029_v8 }
 0x816   : > { %2739 = vmatpush3.msra.mxu0 %v2466_v5 }
 0x817   : > { %2740 = vmatprep.subr.mxu0 %v3029_v8 }
 0x8d1   : > { %v1303_v43 = vpop.f32.mrf.mxu0 }
 0x8d2   : > { %v1304_v44 = vadd.f32 %v2458_v42, %v1303_v43 }
 0x8d3   : > { %v2698_v45 = vpop.f32.mrf.mxu0 }
 0x8d4   : > { %v1307_v46 = vmul.f32 %v1304_v44, %v1304_v44 }
 0x8d6   : > { %v1308_v47 = vmul.f32 %v1307_v46, %v1304_v44 }
 0x8d8   : > { %v1309_v48 = vmul.f32 0.044715, %v1308_v47 }
 0x8da   : > { %v1310_v49 = vadd.f32 %v1309_v48, %v1304_v44 }
 0x8dc   : > { %v1311_v50 = vmul.f32 0.7978846, %v1310_v49 }
 0x8de   : > { %2926 = vtanh.f32 %v1311_v50 }
 0x8eb   : > { %v2927_v51 = vpop.eup %2926 }
 0x8ec   : > { %v1313_v52 = vadd.f32 1.0, %v2927_v51 }
 0x8ee   : > { %v1314_v53 = vmul.f32 0.5, %v1313_v52 }
 0x8f0   : > { %v1315_v54 = vmul.f32 %v1314_v53, %v1304_v44 }
 0x8f2   : > { %2732 = vmatmul.mubr.f32.vlgmr.msra.gmra.mxu1 %v1315_v54 }
 0x8f3   : > { %2747 = vmatprep.mubr.msk.bf16.mxu1 %vm3030_vm1, %v3029_v8 }
 0x9b2   : > { %v1405_v56 = vpop.f32.mrf.mxu1 }
 0x9b3   : > { %v1406_v57 = vadd.f32 %v2460_v55, %v1405_v56 }
 0x9b4   : > { %v2733_v58 = vpop.f32.mrf.mxu1 }
 0x9b5   : > { %v3441_v59 = vadd.f32 %v1406_v57, %v3337_v6  ;;  %v2465_v6 = vld [vmem:[%s3790_s2 + $0x20] sm:$0xff] }
 0x9b6   : > { %2741 = vmatpush3.msra.mxu0 %v2465_v6 }
 0x9b7   : > { %v1414_v60 = vsel %vm537_vm0, %v3441_v59, 0.0  ;;  %2751 = vmatprep.subr.bf16.mxu0 %v3029_v8 }
 0x9b8   : > { %1415 = vadd.xlane.f32.xlu0 %v1414_v60 }
 0xa41   : > { %v1416_v61 = vpop.xlane.xlu0 %1415 }
 0xa42   : > { %v1417_v62 = vmul.f32 0.03125, %v1416_v61 }
 0xa44   : > { %v1418_v63 = vsub.f32 %v3441_v59, %v1417_v62 }
 0xa46   : > { %v1419_v1 = vmul.f32 %v1418_v63, %v1418_v63 }
 0xa48   : > { %v1420_v2 = vsel %vm537_vm0, %v1419_v1, 0.0 }
 0xa49   : > { %1421 = vadd.xlane.f32.xlu1 %v1420_v2 }
 0xad2   : > { %v1422_v7 = vpop.xlane.xlu1 %1421 }
 0xad3   : > { %v1423_v9 = vmul.f32 0.03125, %v1422_v7 }
 0xad5   : > { %v1424_v10 = vadd.f32 1e-05, %v1423_v9 }
 0xad7   : > { %2928 = vrsqrt.f32 %v1424_v10 }
 0xae4   : > { %v2929_v11 = vpop.eup %2928 }
 0xae5   : > { %v1426_v13 = vmul.f32 %v2929_v11, %v1418_v63 }
 0xae7   : > { %v1433_v0 = vmul.f32 %v2463_v12, %v1426_v13 }
 0xae9   : > { %v1440_v15 = vadd.f32 %v2464_v14, %v1433_v0 }
 0xaeb   : > { %2743 = vmatmul.mubr.msk.f32.vlgmr.msra.gmra.mxu0 %vm537_vm0, %v1440_v15 }
 0xaec   : > { %2753 = vmatprep.mubr.msk.bf16.mxu0 %vm3030_vm1, %v3029_v8 }
 0xbab   : > { %v1523_v17 = vpop.f32.mrf.mxu0 }
 0xbac   : > { %v1524_v18 = vadd.f32 %v2470_v16, %v1523_v17 }
 0xbad   : > { %v2744_v19 = vpop.f32.mrf.mxu0 }
 0xbae   : > { %v3475_v20 = vpack.c.bf16 %v1524_v18, %v1524_v18 }
 0xbb0   : > { %1529 = vrot.lane.b32.xlu0 %v3475_v20, %s3797_s27  ;;  %s3805_s27 = smov 48  }
 0xbb4   : > { %1639 = vrot.lane.b32.xlu0 %v3475_v20, %s3798_s28  ;;  %s3806_s28 = smov 56  }
 0xbb8   : > { %1637 = vrot.lane.b32.xlu0 %v3475_v20, %s3799_s19  ;;  %s3807_s19 = smov 40  }
 0xbbc   : > { %1747 = vrot.lane.b32.xlu0 %v3475_v20, %s3800_s22  ;;  %s3808_s22 = smov 8  }
 0xbc0   : > { %1857 = vrot.lane.b32.xlu0 %v3475_v20, %s3801_s20  ;;  %s3809_s20 = smov 16  }
 0xc22   : > { %v1530_v21 = vpop.permute.xlu0 %1529 }
 0xc23   : > { %v1535_v22 = vsel %vm654_vm2, %v1530_v21, 0 }
 0xc24   : > { %2746 = vmatpush3.bf16.xpose.msra.mxu1 %v1535_v22 }
 0xc25   : > { %2763 = vmatprep.subr.bf16.mxu1 %v3029_v8 }
 0xc26   : > { %v1640_v38 = vpop.permute.xlu0 %1639 }
 0xc27   : > { %v1645_v40 = vsel %vm654_vm2, %v1640_v38, 0  ;;  %v2483_v38 = vld [vmem:[%s3793_s4 + $0x38] sm:$0xff] }
 0xc2a   : > { %v1638_v42 = vpop.permute.xlu0 %1637 }
 0xc2b   : > { %2748 = vmatmul.mubr.msk.bf16.vlgmr.msra.gmra.mxu1 %vm654_vm2, %v3475_v20 }
 0xc2c   : > { %2765 = vmatprep.mubr.msk.bf16.mxu1 %vm3030_vm1, %v3029_v8 }
 0xc2e   : > { %v1748_v45 = vpop.permute.xlu0 %1747 }
 0xc32   : > { %v1858_v47 = vpop.permute.xlu0 %1857 }
 0xceb   : > { %v1571_v23 = vpop.f32.mrf.mxu1 }
 0xcec   : > { %v1577_v24 = vsel %vm654_vm2, %v1571_v23, -inf }
 0xced   : > { %1578 = vmax.xlane.f32.xlu1 %v1577_v24  ;;  %v2749_v25 = vpop.f32.mrf.mxu1 }
 0xcef   : > { %v1574_v26 = vpop.f32.mrf.mxu1 }
 0xcf1   : > { %v2750_v27 = vpop.f32.mrf.mxu1 }
 0xd76   : > { %v1579_v28 = vpop.xlane.xlu1 %1578 }
 0xd77   : > { %v1580_v29 = vsub.f32 %v1571_v23, %v1579_v28 }
 0xd79   : > { %v1581_v30 = vmul.f32 1.442695, %v1580_v29 }
 0xd7b   : > { %2930 = vpow2.f32 %v1581_v30 }
 0xd88   : > { %v2931_v31 = vpop.eup %2930 }
 0xd89   : > { %v1583_v32 = vsel %vm654_vm2, %v2931_v31, 0.0 }
 0xd8a   : > { %1584 = vadd.xlane.f32.xlu1 %v1583_v32 }
 0xd9b   : > { %1589 = vrot.lane.b32.xlu1 %v3475_v20, %s3802_s21  ;;  %s3810_s21 = smov 24  }
 0xd9f   : > { %1749 = vrot.lane.b32.xlu1 %v3475_v20, %s3803_s1 }
 0xda3   : > { %1859 = vrot.lane.b32.xlu1 %v3475_v20, %s3804_s30  ;;  %s2519_s30 = sshll.u32 %s3160_s11, 7 }
 0xda4   : > { %s3692_s6 = scalar_lea.hbm %s3755_s16, %s2519_s30 }
 0xe13   : > { %v1585_v33 = vpop.xlane.xlu1 %1584 }
 0xe14   : > { %2932 = vrcp.f32 %v1585_v33 }
 0xe17   : > { %v1590_v34 = vpop.permute.xlu1 %1589 }
 0xe18   : > { %v1595_v35 = vsel %vm718_vm3, %v1590_v34, 0 }
 0xe19   : > { %2752 = vmatpush3.bf16.msra.mxu0 %v1595_v35 }
 0xe1a   : > { %2757 = vmatprep.subr.bf16.mxu0 %v3029_v8 }
 0xe1b   : > { %v1750_v41 = vpop.permute.xlu1 %1749 }
 0xe1c   : > { %v1755_v43 = vsel %vm654_vm2, %v1750_v41, 0 }
 0xe1f   : > { %v1860_v44 = vpop.permute.xlu1 %1859 }
 0xe20   : > { %v1865_v46 = vsel %vm654_vm2, %v1860_v44, 0 }
 0xe21   : > { %v2933_v36 = vpop.eup %2932 }
 0xe22   : > { %v1587_v37 = vmul.f32 %v2933_v36, %v2931_v31 }
 0xe24   : > { %v1588_v39 = vpack.c.bf16 %v1587_v37, %v1587_v37 }
 0xe26   : > { %2754 = vmatmul.mubr.msk.bf16.vlgmr.msra.gmra.mxu0 %vm654_vm2, %v1588_v39  ;;  %v2482_v39 = vld [vmem:[%s3793_s4 + $0x30] sm:$0xff] }
 0xe27   : > { %2758 = vmatpush3.bf16.xpose.msra.mxu0 %v1645_v40  ;;  %2759 = vmatprep.mubr.msk.bf16.mxu0 %vm3030_vm1, %v3029_v8  ;;  %v2481_v40 = vld [vmem:[%s3793_s4 + $0x28] sm:$0xff] }
 0xe28   : > { %2769 = vmatprep.subr.bf16.mxu0 %v3029_v8 }
 0xe2e   : > { %2760 = vmatmul.mubr.msk.bf16.vlgmr.msra.gmra.mxu0 %vm654_vm2, %v1638_v42  ;;  %v2480_v42 = vld [vmem:[%s3793_s4 + $0x20] sm:$0xff] }
 0xe2f   : > { %2770 = vmatpush3.bf16.xpose.msra.mxu0 %v1755_v43  ;;  %2771 = vmatprep.mubr.msk.bf16.mxu0 %vm3030_vm1, %v3029_v8 }
 0xe30   : > { %2781 = vmatprep.subr.bf16.mxu0 %v3029_v8 }
 0xe36   : > { %2772 = vmatmul.mubr.msk.bf16.vlgmr.msra.gmra.mxu0 %vm654_vm2, %v1748_v45 }
 0xe37   : > { %2782 = vmatpush3.bf16.xpose.msra.mxu0 %v1865_v46  ;;  %2783 = vmatprep.mubr.msk.bf16.mxu0 %vm3030_vm1, %v3029_v8 }
 0xe38   : > { %2793 = vmatprep.subr.mxu0 %v3029_v8 }
 0xe3e   : > { %2784 = vmatmul.mubr.msk.bf16.vlgmr.msra.gmra.mxu0 %vm654_vm2, %v1858_v47 }
 0xe3f   : > { %2801 = vmatprep.mubr.msk.f32.mxu0 %vm3030_vm1, %v3029_v8  ;;  %2794 = vmatpush3.msra.mxu0 %v2483_v38 }
 0xe40   : > { %2795 = vmatprep.subr.mxu0 %v3029_v8 }
 0xe41   : > { %2796 = vmatpush3.msra.mxu0 %v2482_v39 }
 0xe42   : > { %2797 = vmatprep.subr.mxu0 %v3029_v8 }
 0xe43   : > { %2798 = vmatpush3.msra.mxu0 %v2481_v40 }
 0xe44   : > { %2799 = vmatprep.subr.mxu0 %v3029_v8 }
 0xe45   : > { %2800 = vmatpush3.msra.mxu0 %v2480_v42 }
 0xe46   : > { %2815 = vmatprep.subr.mxu0 %v3029_v8 }
 0xee6   : > { %v3521_v48 = vpop.f32.mrf.mxu0 }
 0xee8   : > { %v2755_v49 = vpop.f32.mrf.mxu0 }
 0xeea   : > { %v1634_v50 = vpop.f32.mrf.mxu0 }
 0xeec   : > { %v2756_v51 = vpop.f32.mrf.mxu0 }
 0xeee   : > { %v1681_v52 = vpop.f32.mrf.mxu0 }
 0xeef   : > { %v1687_v53 = vsel %vm654_vm2, %v1681_v52, -inf }
 0xef0   : > { %1688 = vmax.xlane.f32.xlu1 %v1687_v53  ;;  %v2761_v54 = vpop.f32.mrf.mxu0 }
 0xef2   : > { %v1684_v55 = vpop.f32.mrf.mxu0 }
 0xef4   : > { %v2762_v56 = vpop.f32.mrf.mxu0 }
 0xef6   : > { %v1791_v57 = vpop.f32.mrf.mxu0 }
 0xef7   : > { %v1797_v58 = vsel %vm654_vm2, %v1791_v57, -inf }
 0xef8   : > { %1798 = vmax.xlane.f32.xlu0 %v1797_v58  ;;  %v2773_v60 = vpop.f32.mrf.mxu0 }
 0xefa   : > { %v1794_v61 = vpop.f32.mrf.mxu0 }
 0xefc   : > { %v2774_v62 = vpop.f32.mrf.mxu0 }
 0xefd   : > { %v2485_v62 = vld [vmem:[%s3794_s5 + $0x1] ss:$0 sm:$0xff] }
 0xefe   : > { %v1901_v63 = vpop.f32.mrf.mxu0 }
 0xeff   : > { %v1907_v1 = vsel %vm654_vm2, %v1901_v63, -inf }
 0xf00   : > { %1908 = vmax.xlane.f32.xlu0 %v1907_v1  ;;  %v2785_v2 = vpop.f32.mrf.mxu0 }
 0xf02   : > { %v1904_v3 = vpop.f32.mrf.mxu0 }
 0xf04   : > { %v2786_v4 = vpop.f32.mrf.mxu0 }
 0xf79   : > { %v1689_v5 = vpop.xlane.xlu1 %1688 }
 0xf7a   : > { %v1690_v6 = vsub.f32 %v1681_v52, %v1689_v5 }
 0xf7c   : > { %v1691_v7 = vmul.f32 1.442695, %v1690_v6 }
 0xf7e   : > { %2934 = vpow2.f32 %v1691_v7 }
 0xf81   : > { %v1799_v9 = vpop.xlane.xlu0 %1798 }
 0xf82   : > { %v1800_v10 = vsub.f32 %v1791_v57, %v1799_v9 }
 0xf84   : > { %v1801_v11 = vmul.f32 1.442695, %v1800_v10  ;;  %v2494_v10 = vld [vmem:[%s3749_s10 + $0x38] sm:$0xff] }
 0xf86   : > { %2936 = vpow2.f32 %v1801_v11  ;;  %v2492_v11 = vld [vmem:[%s3749_s10 + $0x28] sm:$0xff] }
 0xf89   : > { %v1909_v15 = vpop.xlane.xlu0 %1908 }
 0xf8a   : > { %v1910_v16 = vsub.f32 %v1901_v63, %v1909_v15 }
 0xf8b   : > { %v2935_v12 = vpop.eup %2934 }
 0xf8c   : > { %v1693_v13 = vsel %vm654_vm2, %v2935_v12, 0.0  ;;  %v1911_v17 = vmul.f32 1.442695, %v1910_v16  ;;  %v2489_v16 = vld [vmem:[%s3747_s8 + $0x1] ss:$0 sm:$0xff] }
 0xf8d   : > { %1694 = vadd.xlane.f32.xlu1 %v1693_v13 }
 0xf8e   : > { %2938 = vpow2.f32 %v1911_v17 }
 0xf93   : > { %v2937_v14 = vpop.eup %2936 }
 0xf94   : > { %v1803_v0 = vsel %vm654_vm2, %v2937_v14, 0.0 }
 0xf95   : > { %1804 = vadd.xlane.f32.xlu0 %v1803_v0 }
 0xf9b   : > { %v2939_v18 = vpop.eup %2938 }
 0xf9c   : > { %v1913_v19 = vsel %vm654_vm2, %v2939_v18, 0.0 }
 0xf9e   : > { %1809 = vrot.lane.b32.xlu1 %v3475_v20, %s3805_s27  ;;  %s2321_s27 = sld [smem:[#allocation3 + %s3160_s11]] }
 0xfab   : > { %1699 = vrot.lane.b32.xlu0 %v3475_v20, %s3806_s28  ;;  %s518_s28 = sand.u32 1, %s3018_s0  }
 0xfac   : > { %s2339_s11 = scalar_lea.sflag [#allocation5], %s518_s28 }
 0xfc2   : > { %1914 = vadd.xlane.f32.xlu1 %v1913_v19 }
 0xfd3   : > { %1919 = vrot.lane.b32.xlu1 %v3475_v20, %s3807_s19  ;;  %s2440_s19 = sshll.u32 %s518_s28, 3 }
 0xfd4   : > { %s520_s2 = scalar_lea.vmem [#allocation4], %s2440_s19  ;;  %s3045_s19 = smov [#allocation4]  }
 0xfd5   : > { %s2355_s3 = sshll.u32 %s520_s2, 4  ;;  %s2968_s4 = sshll.u32 %s3045_s19, 4  ;;  %s3694_s3 = int_to_ptr.vmem [resolvable:$true] %s2355_s3  ;;  %s2969_s4 = int_to_ptr.vmem [resolvable:$false] %s2968_s4 }
 0xfd6   : > { %s2970_s5 = scalar_lea.vmem %s2969_s4, 256  ;;  %p2971_p5 = scmp.lt.s32.totalorder %s3694_s3, %s2969_s4 }
0x1016   : > { %v1695_v21 = vpop.xlane.xlu1 %1694 }
0x1017   : > { %2940 = vrcp.f32 %v1695_v21 }
0x101a   : > { %v1810_v27 = vpop.permute.xlu1 %1809 }
0x101b   : > { %v1815_v29 = vsel %vm718_vm3, %v1810_v27, 0  ;;  %v2508_v27 = vld [vmem:[%s3751_s12 + $0xd0] sm:$0xff] }
0x101e   : > { %v1805_v22 = vpop.xlane.xlu0 %1804 }
0x101f   : > { %2942 = vrcp.f32 %v1805_v22  ;;  %v2513_v22 = vld [vmem:[%s3751_s12 + $0xf8] sm:$0xff] }
0x1022   : > { %v1700_v23 = vpop.permute.xlu0 %1699 }
0x1023   : > { %v1705_v24 = vsel %vm718_vm3, %v1700_v23, 0  ;;  %v2512_v23 = vld [vmem:[%s3751_s12 + $0xf0] sm:$0xff] }
0x1024   : > { %v2941_v25 = vpop.eup %2940  ;;  %2764 = vmatpush3.bf16.msra.mxu1 %v1705_v24  ;;  %v2511_v24 = vld [vmem:[%s3751_s12 + $0xe8] sm:$0xff] }
0x1025   : > { %2775 = vmatprep.subr.bf16.mxu1 %v3029_v8  ;;  %v1697_v26 = vmul.f32 %v2941_v25, %v2935_v12  ;;  %v2491_v12 = vld [vmem:[%s3749_s10 + $0x20] sm:$0xff] }
0x1026   : > { %v2510_v25 = vld [vmem:[%s3751_s12 + $0xe0] sm:$0xff] }
0x1027   : > { %v1698_v28 = vpack.c.bf16 %v1697_v26, %v1697_v26  ;;  %v2509_v26 = vld [vmem:[%s3751_s12 + $0xd8] sm:$0xff] }
0x1029   : > { %2766 = vmatmul.mubr.msk.bf16.vlgmr.msra.gmra.mxu1 %vm654_vm2, %v1698_v28  ;;  %v2507_v28 = vld [vmem:[%s3751_s12 + $0xc8] sm:$0xff] }
0x102a   : > { %2776 = vmatpush3.bf16.msra.mxu1 %v1815_v29  ;;  %2777 = vmatprep.mubr.msk.bf16.mxu1 %vm3030_vm1, %v3029_v8  ;;  %v2506_v29 = vld [vmem:[%s3751_s12 + $0xc0] sm:$0xff] }
0x102b   : > { %2787 = vmatprep.subr.bf16.mxu1 %v3029_v8 }
0x102c   : > { %v2943_v20 = vpop.eup %2942 }
0x102d   : > { %v1807_v30 = vmul.f32 %v2943_v20, %v2937_v14  ;;  %v2505_v20 = vld [vmem:[%s3751_s12 + $0xb8] sm:$0xff] }
0x102f   : > { %v1808_v31 = vpack.c.bf16 %v1807_v30, %v1807_v30  ;;  %v2504_v30 = vld [vmem:[%s3751_s12 + $0xb0] sm:$0xff] }
0x1031   : > { %2778 = vmatmul.mubr.msk.bf16.vlgmr.msra.gmra.mxu1 %vm654_vm2, %v1808_v31  ;;  %v2503_v31 = vld [vmem:[%s3751_s12 + $0xa8] sm:$0xff] }
0x1032   : > { %2789 = vmatprep.mubr.msk.bf16.mxu1 %vm3030_vm1, %v3029_v8 }
0x104b   : > { %v1915_v32 = vpop.xlane.xlu1 %1914 }
0x104c   : > { %2944 = vrcp.f32 %v1915_v32  ;;  %v2502_v32 = vld [vmem:[%s3751_s12 + $0xa0] sm:$0xff] }
0x104f   : > { %v1920_v33 = vpop.permute.xlu1 %1919 }
0x1050   : > { %v1925_v34 = vsel %vm718_vm3, %v1920_v33, 0  ;;  %v2501_v33 = vld [vmem:[%s3751_s12 + $0x98] sm:$0xff] }
0x1051   : > { %2788 = vmatpush3.bf16.msra.mxu1 %v1925_v34  ;;  %v2500_v34 = vld [vmem:[%s3751_s12 + $0x90] sm:$0xff] }
0x1052   : > { %2804 = vmatprep.subr.mxu1 %v3029_v8 }
0x1059   : > { %v2945_v35 = vpop.eup %2944 }
0x105a   : > { %v1917_v36 = vmul.f32 %v2945_v35, %v2939_v18  ;;  %v2490_v18 = vld [vmem:[%s3748_s9 + $0x1] ss:$0 sm:$0xff]  ;;  %v2499_v35 = vld [vmem:[%s3751_s12 + $0x88] sm:$0xff] }
0x105c   : > { %v1918_v37 = vpack.c.bf16 %v1917_v36, %v1917_v36  ;;  %v2498_v36 = vld [vmem:[%s3751_s12 + $0x80] sm:$0xff] }
0x105e   : > { %2790 = vmatmul.mubr.msk.bf16.vlgmr.msra.gmra.mxu1 %vm654_vm2, %v1918_v37  ;;  %v2496_v37 = vld [vmem:[%s3796_s26 + $0x1] ss:$0 sm:$0xff] }
0x105f   : > { %2812 = vmatprep.mubr.msk.f32.mxu1 %vm3030_vm1, %v3029_v8  ;;  %2805 = vmatpush3.msra.mxu1 %v2494_v10 }
0x1060   : > { %2806 = vmatprep.subr.mxu1 %v3029_v8 }
0x10e9   : > { %v1741_v41 = vpop.f32.mrf.mxu1 }
0x10ea   : > { %1968 = vrot.lane.b32.xlu0 %v1741_v41, %s3808_s22 }
0x10eb   : > { %v2767_v43 = vpop.f32.mrf.mxu1 }
0x10ed   : > { %v1744_v44 = vpop.f32.mrf.mxu1 }
0x10ef   : > { %v2768_v45 = vpop.f32.mrf.mxu1 }
0x10f1   : > { %v1851_v46 = vpop.f32.mrf.mxu1 }
0x10f2   : > { %1972 = vrot.lane.b32.xlu1 %v1851_v46, %s3809_s20 }
0x10f3   : > { %v2779_v47 = vpop.f32.mrf.mxu1 }
0x10f5   : > { %v1854_v49 = vpop.f32.mrf.mxu1 }
0x10f7   : > { %v2780_v50 = vpop.f32.mrf.mxu1 }
0x111e   : > { %v1961_v51 = vpop.f32.mrf.mxu1 }
0x111f   : > { %1976 = vrot.lane.b32.xlu0 %v1961_v51, %s3810_s21 }
0x1120   : > { %v2791_v52 = vpop.f32.mrf.mxu1 }
0x1122   : > { %v1964_v53 = vpop.f32.mrf.mxu1 }
0x1124   : > { %v2792_v54 = vpop.f32.mrf.mxu1 }
0x115c   : > { %v1969_v55 = vpop.permute.xlu0 %1968 }
0x115d   : > { %v1979_v57 = vsel %vm654_vm2, %v3521_v48, %v1969_v55 }
0x1164   : > { %v1973_v56 = vpop.permute.xlu1 %1972 }
0x1165   : > { %v1980_v58 = vsel %vm1105_vm4, %v1979_v57, %v1973_v56 }
0x1191   : > { %v1977_v60 = vpop.permute.xlu0 %1976 }
0x1192   : > { %v1981_v61 = vsel %vm1107_vm5, %v1980_v58, %v1977_v60 }
0x1193   : > { %2802 = vmatmul.mubr.msk.f32.vlgmr.msra.gmra.mxu0 %vm537_vm0, %v1981_v61 }
0x1194   : > { %2847 = vmatprep.mubr.msk.f32.mxu0 %vm3030_vm1, %v3029_v8  ;;  %2816 = vmatpush3.msra.mxu0 %v2513_v22 }
0x1195   : > { %2817 = vmatprep.subr.mxu0 %v3029_v8 }
0x1196   : > { %2818 = vmatpush3.msra.mxu0 %v2512_v23 }
0x1197   : > { %2819 = vmatprep.subr.mxu0 %v3029_v8 }
0x1198   : > { %2820 = vmatpush3.msra.mxu0 %v2511_v24 }
0x1199   : > { %2821 = vmatprep.subr.mxu0 %v3029_v8 }
0x119a   : > { %2822 = vmatpush3.msra.mxu0 %v2510_v25 }
0x119b   : > { %2823 = vmatprep.subr.mxu0 %v3029_v8 }
0x119c   : > { %2824 = vmatpush3.msra.mxu0 %v2509_v26 }
0x119d   : > { %2825 = vmatprep.subr.mxu0 %v3029_v8 }
0x119e   : > { %2826 = vmatpush3.msra.mxu0 %v2508_v27 }
0x119f   : > { %2827 = vmatprep.subr.mxu0 %v3029_v8 }
0x11a0   : > { %2828 = vmatpush3.msra.mxu0 %v2507_v28 }
0x11a1   : > { %2829 = vmatprep.subr.mxu0 %v3029_v8 }
0x11a2   : > { %2830 = vmatpush3.msra.mxu0 %v2506_v29 }
0x11a3   : > { %2831 = vmatprep.subr.mxu0 %v3029_v8 }
0x11a4   : > { %2832 = vmatpush3.msra.mxu0 %v2505_v20 }
0x11a5   : > { %2833 = vmatprep.subr.mxu0 %v3029_v8 }
0x11a6   : > { %2834 = vmatpush3.msra.mxu0 %v2504_v30 }
0x11a7   : > { %2835 = vmatprep.subr.mxu0 %v3029_v8 }
0x11a8   : > { %2836 = vmatpush3.msra.mxu0 %v2503_v31 }
0x11a9   : > { %2837 = vmatprep.subr.mxu0 %v3029_v8 }
0x11aa   : > { %2838 = vmatpush3.msra.mxu0 %v2502_v32 }
0x11ab   : > { %2839 = vmatprep.subr.mxu0 %v3029_v8 }
0x11ac   : > { %2840 = vmatpush3.msra.mxu0 %v2501_v33 }
0x11ad   : > { %2841 = vmatprep.subr.mxu0 %v3029_v8 }
0x11ae   : > { %2842 = vmatpush3.msra.mxu0 %v2500_v34 }
0x11af   : > { %2843 = vmatprep.subr.mxu0 %v3029_v8 }
0x11b0   : > { %2844 = vmatpush3.msra.mxu0 %v2499_v35 }
0x11b1   : > { %2845 = vmatprep.subr.mxu0 %v3029_v8 }
0x11b2   : > { %2846 = vmatpush3.msra.mxu0 %v2498_v36 }
0x1253   : > { %v2064_v63 = vpop.f32.mrf.mxu0 }
0x1254   : > { %v2065_v1 = vadd.f32 %v2485_v62, %v2064_v63 }
0x1255   : > { %v2803_v2 = vpop.f32.mrf.mxu0 }
0x1256   : > { %v3580_v3 = vadd.f32 %v2065_v1, %v3441_v59  ;;  %v2493_v59 = vld [vmem:[%s3749_s10 + $0x30] sm:$0xff]  ;;  %v2322_v2 = vlaneseq }
0x1257   : > { %2807 = vmatpush3.msra.mxu1 %v2493_v59 }
0x1258   : > { %v2073_v48 = vsel %vm537_vm0, %v3580_v3, 0.0  ;;  %2808 = vmatprep.subr.mxu1 %v3029_v8 }
0x1259   : > { %2074 = vadd.xlane.f32.xlu1 %v2073_v48  ;;  %2809 = vmatpush3.msra.mxu1 %v2492_v11  ;;  %v2516_v48 = vld [vmem:[%s3753_s14] ss:$0 sm:$0xff] }
0x125a   : > { %2810 = vmatprep.subr.mxu1 %v3029_v8  ;;  %v2515_v8 = vld [vmem:[%s3752_s13 + $0x1] ss:$0 sm:$0xff] }
0x125b   : > { %2811 = vmatpush3.msra.mxu1 %v2491_v12 }
0x12e2   : > { %v2075_v4 = vpop.xlane.xlu1 %2074 }
0x12e3   : > { %v2076_v5 = vmul.f32 0.03125, %v2075_v4  ;;  %v2323_v4 = vshrl.u32 %v2322_v2, 7 }
0x12e5   : > { %v2077_v6 = vsub.f32 %v3580_v3, %v2076_v5 }
0x12e7   : > { %v2078_v7 = vmul.f32 %v2077_v6, %v2077_v6 }
0x12e9   : > { %v2079_v9 = vsel %vm537_vm0, %v2078_v7, 0.0  ;;  %v2517_v7 = vld [vmem:[%s3754_s15] ss:$0 sm:$0xff] }
0x12ea   : > { %2080 = vadd.xlane.f32.xlu0 %v2079_v9 }
0x1373   : > { %v2081_v13 = vpop.xlane.xlu0 %2080 }
0x1374   : > { %v2082_v14 = vmul.f32 0.03125, %v2081_v13 }
0x1376   : > { %v2083_v0 = vadd.f32 1e-05, %v2082_v14 }
0x1378   : > { %2946 = vrsqrt.f32 %v2083_v0 }
0x1385   : > { %v2947_v15 = vpop.eup %2946 }
0x1386   : > { %v2085_v17 = vmul.f32 %v2947_v15, %v2077_v6  ;;  %v2324_v6 = vstv %s2321_s27  ;;  %s2964_s27 = scalar_lea.vmem %s3694_s3, 128 }
0x1387   : > { %vm2325_vm6 = vcmp.eq.s32.totalorder %v2323_v4, %v2324_v6  ;;  %p2965_p2 = scmp.ne.s32.totalorder %s3694_s3, %s2964_s27  ;;  %p2972_p6 = scmp.lt.s32.totalorder %s2970_s5, %s2964_s27 }
0x1388   : > { %v2092_v19 = vmul.f32 %v2489_v16, %v2085_v17 }
0x1389   : > { %p2966_p3 = pnand %p2965_p2, %p3177_p10  ;;  %p2973_p7 = por %p2972_p6, %p2971_p5 }
0x138a   : > { %v2099_v21 = vadd.f32 %v2490_v18, %v2092_v19 }
0x138b   : > { %p2967_p4 = pneg %p2966_p3 }
0x138c   : > { %2813 = vmatmul.mubr.msk.f32.vlgmr.msra.gmra.mxu1 %vm537_vm0, %v2099_v21 }
0x138d   : > { %p2974_p8 = pnand %p2973_p7, %p2967_p4 }
0x144c   : > { %v2182_v38 = vpop.f32.mrf.mxu1 }
0x144d   : > { %v2183_v39 = vadd.f32 %v2496_v37, %v2182_v38 }
0x144e   : > { %v2814_v40 = vpop.f32.mrf.mxu1 }
0x144f   : > { %v2186_v41 = vmul.f32 %v2183_v39, %v2183_v39 }
0x1451   : > { %v2187_v42 = vmul.f32 %v2186_v41, %v2183_v39 }
0x1453   : > { %v2188_v43 = vmul.f32 0.044715, %v2187_v42 }
0x1455   : > { %v2189_v44 = vadd.f32 %v2188_v43, %v2183_v39 }
0x1457   : > { %v2190_v45 = vmul.f32 0.7978846, %v2189_v44 }
0x1459   : > { %2948 = vtanh.f32 %v2190_v45 }
0x1466   : > { %v2949_v46 = vpop.eup %2948 }
0x1467   : > { %v2192_v47 = vadd.f32 1.0, %v2949_v46 }
0x1469   : > { %v2193_v49 = vmul.f32 0.5, %v2192_v47 }
0x146b   : > { %v2194_v50 = vmul.f32 %v2193_v49, %v2183_v39 }
0x146d   : > { %2848 = vmatmul.mubr.f32.vlgmr.msra.gmra.mxu0 %v2194_v50 }
0x152d   : > { %v2286_v51 = vpop.f32.mrf.mxu0 }
0x152e   : > { %v2287_v52 = vadd.f32 %v2515_v8, %v2286_v51 }
0x152f   : > { %v2849_v53 = vpop.f32.mrf.mxu0 }
0x1530   : > { %v2290_v54 = vadd.f32 %v2287_v52, %v3580_v3 }
0x1532   : > { %v2293_v55 = vsel %vm537_vm0, %v2290_v54, 0.0 }
0x1533   : > { %2294 = vadd.xlane.f32.xlu0 %v2293_v55 }
0x15bc   : > { %v2295_v56 = vpop.xlane.xlu0 %2294 }
0x15bd   : > { %v2296_v57 = vmul.f32 0.03125, %v2295_v56 }
0x15bf   : > { %v2297_v58 = vsub.f32 %v2290_v54, %v2296_v57 }
0x15c1   : > { %v2298_v60 = vmul.f32 %v2297_v58, %v2297_v58 }
0x15c3   : > { %v2299_v61 = vsel %vm537_vm0, %v2298_v60, 0.0 }
0x15c4   : > { %2300 = vadd.xlane.f32.xlu1 %v2299_v61 }
0x164d   : > { %v2301_v62 = vpop.xlane.xlu1 %2300 }
0x164e   : > { %v2302_v63 = vmul.f32 0.03125, %v2301_v62 }
0x1650   : > { %v2303_v1 = vadd.f32 1e-05, %v2302_v63 }
0x1652   : > { %2950 = vrsqrt.f32 %v2303_v1 }
0x165f   : > { %v2951_v3 = vpop.eup %2950 }
0x1660   : > { %v2305_v5 = vmul.f32 %v2951_v3, %v2297_v58 }
0x1662   : > { %v2312_v9 = vmul.f32 %v2516_v48, %v2305_v5 }
0x1664   : > { %v2319_v10 = vadd.f32 %v2517_v7, %v2312_v9 }
0x1666   : > { %2320 = vst.msk [vmem:[%s520_s2] sm:$0xff] %vm537_vm0, %v2319_v10  ;;  %v2328_v59 = vsel %vm2325_vm6, %v2319_v10, 0.0 }
0x1667   : > { %v2329_v11 = vsel %vm537_vm0, %v2328_v59, 0.0 }
0x1668   : > { %2977 = shalt.err (!%p2974_p8)
}
0x1669   : > { %s2978_s2 = scalar_lea.hbm %s3692_s6, 128  ;;  %s2982_s20 = scalar_lea.hbm %s3755_s16, 256 }
0x166a   : > { %p2979_p9 = scmp.ne.s32.totalorder %s3692_s6, %s2978_s2  ;;  %p2983_p0 = scmp.lt.s32.totalorder %s3692_s6, %s3755_s16 }
0x166b   : > { %p2984_p1 = scmp.lt.s32.totalorder %s2982_s20, %s2978_s2 }
0x166c   : > { %p2980_p12 = pnand %p2979_p9, %p3177_p10 }
0x166d   : > { %p2985_p2 = por %p2984_p1, %p2983_p0 }
0x166e   : > { %p2981_p13 = pneg %p2980_p12 }
0x1670   : > { %p2986_p3 = pnand %p2985_p2, %p2981_p13 }
0x1672   : > { %2989 = shalt.err (!%p2986_p3)
}
0x1673   : > { %2850 = dma.vmem_to_hbm [thread:$0]  (%p3177_p10), %s3694_s3, 128, %s3692_s6, %s2339_s11   ;;  %v2330_v12 = vrot.slane %v2329_v11, 4  ;;  %vm2336_vm7 = vcmask 253952  }
0x1674   : > { %s532_s19 = scalar_lea.vmem %s3756_s17, %s3189_s25 }
0x1675   : > { %v2331_v13 = vadd.f32 %v2330_v12, %v2329_v11 }
0x1677   : > { %v2332_v14 = vrot.slane %v2331_v13, 2 }
0x1679   : > { %v2333_v0 = vadd.f32 %v2332_v14, %v2331_v13 }
0x167b   : > { %v2334_v15 = vrot.slane %v2333_v0, 1 }
0x167d   : > { %v2335_v16 = vadd.f32 %v2334_v15, %v2333_v0 }
0x167f   : > { %2337 = vst.msk [vmem:[%s532_s19] sm:$0x1] %vm2336_vm7, %v2335_v16 }
0x1680 PF: > { %p2856_p4 = scmp.ge.s32.totalorder %s3026_s18, 2  ;;  %s2370_s23 = sand.u32 1, %s3014_s29  }
0x1681   : > { %s2371_s3 = scalar_lea.sflag [#allocation5], %s2370_s23 }
0x1682   : > { %p2853_p10 = pnand %p2856_p4, %p3181_p11 }
0x1684   : > { %p2854_p5 = pneg %p2853_p10 }
0x1686   : > { %3009 = dma.done.wait (%p2854_p5), %s2371_s3, 128  }
0x1687   : > { %3011 = vsyncadd (%p2854_p5), %s2371_s3, 4294967168  ;;  %s3811_s18 = sld [smem:[#allocation9_spill]]  ;;  %s3814_s29 = smov %s3018_s0 }
0x1688   : > { %s3812_s6 = sld [smem:[#allocation8_spill]] }
0x1689   : > { %s3813_s30 = sld [smem:[#allocation10_spill]] }
0x168d   : > { %p34_p6 = scmp.ge.s32.totalorder %s3811_s18, 4  }
0x168e   : > { %s3815_s0 = smov %s3812_s6 }
0x168f   :  { %36 = sbr.rel (!%p34_p6) target bundleno = 32 (0x20), region = 139 }
0x1694   :  { %2382 = vsyncpa [#allocation5], 1 }
0x1695   :  { %2384 = vsyncpa [#allocation5 + $0x1], 1 }

</bundles_post_ra>
